<compile_context>
chip_gen: v7x
topology: tpu7x:2x2x1
jax: 0.10.0
libtpu: 0.0.40
codegen_flags: <defaults>
</compile_context>

<pallas_src>
import math
import functools

import jax
import jax.numpy as jnp
from jax.experimental import pallas as pl
from jax.experimental.pallas import tpu as pltpu


# ----------------------------- tiling helper -----------------------------

def _pick_tile(dim, target):
    # Use `target` only when it evenly divides `dim`; otherwise fall back to the full extent
    # (full-extent blocks are always legal w.r.t. the (8,128) divisibility rule).
    return target if (dim >= target and dim % target == 0) else dim


# ----------------------------- Pallas kernels -----------------------------

def _matmul_bias_kernel(x_ref, w_ref, b_ref, o_ref):
    # x: (tm, K), w: (K, tn), b: (1, tn) -> o: (tm, tn)
    o_ref[...] = (jnp.dot(x_ref[...], w_ref[...], preferred_element_type=jnp.float32)
                  + b_ref[...]).astype(o_ref.dtype)


def linear(x2d, w, b, *, tm_target=256, tn_target=256):
    """y = x @ w + b, tiled over (M, N) with K-resident weights.

    Q/K/V (and K/V) projection fusion is achieved by calling this once with the
    concatenated weight, so the activation is read from HBM a single time.
    """
    # TODO(synk): add a K ('arbitrary') grid axis + f32 VMEM accumulator for very large K
    #             (not needed at these toy sizes; K is always resident here).
    M, K = x2d.shape
    N = w.shape[1]
    tm = _pick_tile(M, tm_target)
    tn = _pick_tile(N, tn_target)
    return pl.pallas_call(
        _matmul_bias_kernel,
        out_shape=jax.ShapeDtypeStruct((M, N), jnp.float32),
        grid=(M // tm, N // tn),
        in_specs=[
            pl.BlockSpec((tm, K), lambda i, j: (i, 0)),
            pl.BlockSpec((K, tn), lambda i, j: (0, j)),
            pl.BlockSpec((1, tn), lambda i, j: (0, j)),
        ],
        out_specs=pl.BlockSpec((tm, tn), lambda i, j: (i, j)),
        compiler_params=pltpu.CompilerParams(
            dimension_semantics=("parallel", "parallel")),
    )(x2d, w, b.reshape(1, N))


def _layernorm(y, g, b):
    # PyTorch LayerNorm, eps = 1e-5, f32 math
    mean = jnp.mean(y, axis=-1, keepdims=True)
    var = jnp.mean(jnp.square(y - mean), axis=-1, keepdims=True)
    return (y - mean) * jax.lax.rsqrt(var + 1e-5) * g + b


def _proj_add_ln_kernel(x_ref, w_ref, b_ref, r_ref, g_ref, bb_ref, o_ref):
    # fused sublayer epilogue:  LayerNorm(residual + x @ w + b)
    y = jnp.dot(x_ref[...], w_ref[...], preferred_element_type=jnp.float32) + b_ref[...]
    o_ref[...] = _layernorm(y + r_ref[...], g_ref[...], bb_ref[...]).astype(o_ref.dtype)


def proj_add_layernorm(x2d, w, b, res2d, gamma, beta, *, tm_target=256):
    M, K = x2d.shape
    N = w.shape[1]
    tm = _pick_tile(M, tm_target)
    return pl.pallas_call(
        _proj_add_ln_kernel,
        out_shape=jax.ShapeDtypeStruct((M, N), jnp.float32),
        grid=(M // tm,),
        in_specs=[
            pl.BlockSpec((tm, K), lambda i: (i, 0)),
            pl.BlockSpec((K, N), lambda i: (0, 0)),
            pl.BlockSpec((1, N), lambda i: (0, 0)),
            pl.BlockSpec((tm, N), lambda i: (i, 0)),
            pl.BlockSpec((1, N), lambda i: (0, 0)),
            pl.BlockSpec((1, N), lambda i: (0, 0)),
        ],
        out_specs=pl.BlockSpec((tm, N), lambda i: (i, 0)),
        compiler_params=pltpu.CompilerParams(dimension_semantics=("parallel",)),
    )(x2d, w, b.reshape(1, N), res2d, gamma.reshape(1, N), beta.reshape(1, N))


def _ffn_add_ln_kernel(x_ref, w1_ref, b1_ref, w2_ref, b2_ref, g_ref, bb_ref, o_ref):
    # fused position-wise FFN + residual + LayerNorm:
    #   LayerNorm(x + relu(x @ w1 + b1) @ w2 + b2)
    x = x_ref[...]
    h = jnp.dot(x, w1_ref[...], preferred_element_type=jnp.float32) + b1_ref[...]
    h = jnp.maximum(h, 0.0)
    y = jnp.dot(h, w2_ref[...], preferred_element_type=jnp.float32) + b2_ref[...]
    o_ref[...] = _layernorm(y + x, g_ref[...], bb_ref[...]).astype(o_ref.dtype)


def ffn_add_layernorm(x2d, w1, b1, w2, b2, gamma, beta, *, tm_target=256):
    M, D = x2d.shape
    Dff = w1.shape[1]
    tm = _pick_tile(M, tm_target)
    return pl.pallas_call(
        _ffn_add_ln_kernel,
        out_shape=jax.ShapeDtypeStruct((M, D), jnp.float32),
        grid=(M // tm,),
        in_specs=[
            pl.BlockSpec((tm, D), lambda i: (i, 0)),
            pl.BlockSpec((D, Dff), lambda i: (0, 0)),
            pl.BlockSpec((1, Dff), lambda i: (0, 0)),
            pl.BlockSpec((Dff, D), lambda i: (0, 0)),
            pl.BlockSpec((1, D), lambda i: (0, 0)),
            pl.BlockSpec((1, D), lambda i: (0, 0)),
            pl.BlockSpec((1, D), lambda i: (0, 0)),
        ],
        out_specs=pl.BlockSpec((tm, D), lambda i: (i, 0)),
        compiler_params=pltpu.CompilerParams(dimension_semantics=("parallel",)),
    )(x2d, w1, b1.reshape(1, Dff), w2, b2.reshape(1, D),
      gamma.reshape(1, D), beta.reshape(1, D))


def _mha_kernel(q_ref, k_ref, v_ref, m_ref, o_ref, *, num_heads, scale):
    # One batch element per grid step. q/k/v carry all heads concatenated along lanes,
    # so the single output store is lane-dense (Sq, H*dk) and no post-kernel transpose is needed.
    q = q_ref[0]        # (Sq, D)
    k = k_ref[0]        # (Sk, D)
    v = v_ref[0]        # (Sk, D)
    mask = m_ref[0]     # (1, Sk) padding mask or (Sq, Sk) causal mask; broadcasts over rows
    D = q.shape[-1]
    dk = D // num_heads
    keep = mask > 0
    neg = jnp.float32(-1e9)

    head_outs = []
    for h in range(num_heads):                      # static unroll, heads are lane slices
        lo = h * dk
        qh = q[:, lo:lo + dk]
        kh = k[:, lo:lo + dk]
        vh = v[:, lo:lo + dk]
        # scores: (Sq, Sk), contract on dk without materializing k.T
        s = jax.lax.dot_general(qh, kh, (((1,), (1,)), ((), ())),
                                preferred_element_type=jnp.float32) * scale
        s = jnp.where(keep, s, neg)
        s = s - jnp.max(s, axis=-1, keepdims=True)
        p = jnp.exp(s)
        p = p * pl.reciprocal(jnp.sum(p, axis=-1, keepdims=True), approx=True)
        head_outs.append(jnp.dot(p, vh, preferred_element_type=jnp.float32))

    o_ref[0] = jnp.concatenate(head_outs, axis=-1).astype(o_ref.dtype)


def mha_attention(q3, k3, v3, mask3, num_heads):
    # q3: (B, Sq, D)   k3, v3: (B, Sk, D)   mask3: (B, 1 or Sq, Sk)
    B, Sq, D = q3.shape
    Sk = k3.shape[1]
    Mq = mask3.shape[1]
    dk = D // num_heads
    kern = functools.partial(_mha_kernel, num_heads=num_heads, scale=1.0 / math.sqrt(dk))
    return pl.pallas_call(
        kern,
        out_shape=jax.ShapeDtypeStruct((B, Sq, D), jnp.float32),
        grid=(B,),
        in_specs=[
            pl.BlockSpec((1, Sq, D), lambda b: (b, 0, 0)),
            pl.BlockSpec((1, Sk, D), lambda b: (b, 0, 0)),
            pl.BlockSpec((1, Sk, D), lambda b: (b, 0, 0)),
            pl.BlockSpec((1, Mq, Sk), lambda b: (b, 0, 0)),
        ],
        out_specs=pl.BlockSpec((1, Sq, D), lambda b: (b, 0, 0)),
        compiler_params=pltpu.CompilerParams(dimension_semantics=("parallel",)),
    )(q3, k3, v3, mask3)


# ----------------------------- model glue (plain JAX) -----------------------------

def self_attention_block(x, mask3, attn_p, ln_g, ln_b, num_heads):
    # fused QKV projection -> attention -> fused out-proj + residual + LayerNorm
    B, S, D = x.shape
    x2d = x.reshape(B * S, D)
    qkv = linear(x2d, attn_p["w_qkv"], attn_p["b_qkv"]).reshape(B, S, 3 * D)
    q, k, v = qkv[..., :D], qkv[..., D:2 * D], qkv[..., 2 * D:]
    o = mha_attention(q, k, v, mask3, num_heads)                      # (B, S, D)
    return proj_add_layernorm(o.reshape(B * S, D), attn_p["wo"], attn_p["bo"],
                              x2d, ln_g, ln_b).reshape(B, S, D)


def cross_attention_block(x, enc_out, mask3, attn_p, ln_g, ln_b, num_heads):
    B, Sq, D = x.shape
    Sk = enc_out.shape[1]
    x2d = x.reshape(B * Sq, D)
    q = linear(x2d, attn_p["wq"], attn_p["bq"]).reshape(B, Sq, D)
    kv = linear(enc_out.reshape(B * Sk, D), attn_p["w_kv"], attn_p["b_kv"]).reshape(B, Sk, 2 * D)
    k, v = kv[..., :D], kv[..., D:]
    o = mha_attention(q, k, v, mask3, num_heads)                      # (B, Sq, D)
    return proj_add_layernorm(o.reshape(B * Sq, D), attn_p["wo"], attn_p["bo"],
                              x2d, ln_g, ln_b).reshape(B, Sq, D)


def encoder_layer(x, src_mask3, p, num_heads):
    B, S, D = x.shape
    x = self_attention_block(x, src_mask3, p["self_attn"], p["ln1_g"], p["ln1_b"], num_heads)
    x = ffn_add_layernorm(x.reshape(B * S, D), p["w1"], p["b1"], p["w2"], p["b2"],
                          p["ln2_g"], p["ln2_b"]).reshape(B, S, D)
    return x


def decoder_layer(x, enc_out, src_mask3, tgt_mask3, p, num_heads):
    B, S, D = x.shape
    x = self_attention_block(x, tgt_mask3, p["self_attn"], p["ln1_g"], p["ln1_b"], num_heads)
    x = cross_attention_block(x, enc_out, src_mask3, p["cross_attn"],
                              p["ln2_g"], p["ln2_b"], num_heads)
    x = ffn_add_layernorm(x.reshape(B * S, D), p["w1"], p["b1"], p["w2"], p["b2"],
                          p["ln3_g"], p["ln3_b"]).reshape(B, S, D)
    return x


def sinusoidal_pe(max_len, d_model):
    pos = jnp.arange(max_len, dtype=jnp.float32)[:, None]
    i = jnp.arange(0, d_model, 2, dtype=jnp.float32)
    div = jnp.exp(-jnp.log(10000.0) * i / d_model)
    pe = jnp.zeros((max_len, d_model), jnp.float32)
    pe = pe.at[:, 0::2].set(jnp.sin(pos * div))
    pe = pe.at[:, 1::2].set(jnp.cos(pos * div))
    return pe


def transformer_forward(params, src, tgt, src_masks, tgt_masks, cfg):
    B, Ss, Din = src.shape
    St = tgt.shape[1]
    D, H, V = cfg["d_model"], cfg["num_heads"], cfg["vocab_size"]
    pe = params["pe"]

    # compact masks: drop the singleton head axis -> (B, 1 or Sq, Sk); broadcast happens in-kernel
    src_mask3 = src_masks[:, 0].astype(jnp.float32)
    tgt_mask3 = tgt_masks[:, 0].astype(jnp.float32)

    # input embedding transform + positional encoding (dropout = identity at inference)
    src = linear(src.reshape(B * Ss, Din), params["emb_w"], params["emb_b"]).reshape(B, Ss, D)
    src = src + pe[:Ss][None, :, :]
    tgt = linear(tgt.reshape(B * St, Din), params["emb_w"], params["emb_b"]).reshape(B, St, D)
    tgt = tgt + pe[:St][None, :, :]

    enc = src
    for lp in params["enc_layers"]:
        enc = encoder_layer(enc, src_mask3, lp, H)

    dec = tgt
    for lp in params["dec_layers"]:
        dec = decoder_layer(dec, enc, src_mask3, tgt_mask3, lp, H)

    out = linear(dec.reshape(B * St, D), params["out_w"], params["out_b"])
    return out.reshape(B, St, V)


# ----------------------------- deterministic parameter init -----------------------------

def _init_linear(key, din, dout):
    w = jax.random.normal(key, (din, dout), jnp.float32) * 0.02
    b = jnp.zeros((dout,), jnp.float32)
    return w, b


def _init_self_attn(key, d_model):
    ks = jax.random.split(key, 4)
    wq, bq = _init_linear(ks[0], d_model, d_model)
    wk, bk = _init_linear(ks[1], d_model, d_model)
    wv, bv = _init_linear(ks[2], d_model, d_model)
    wo, bo = _init_linear(ks[3], d_model, d_model)
    return dict(w_qkv=jnp.concatenate([wq, wk, wv], axis=1),
                b_qkv=jnp.concatenate([bq, bk, bv], axis=0),
                wo=wo, bo=bo)


def _init_cross_attn(key, d_model):
    ks = jax.random.split(key, 4)
    wq, bq = _init_linear(ks[0], d_model, d_model)
    wk, bk = _init_linear(ks[1], d_model, d_model)
    wv, bv = _init_linear(ks[2], d_model, d_model)
    wo, bo = _init_linear(ks[3], d_model, d_model)
    return dict(wq=wq, bq=bq,
                w_kv=jnp.concatenate([wk, wv], axis=1),
                b_kv=jnp.concatenate([bk, bv], axis=0),
                wo=wo, bo=bo)


def init_params(key, cfg):
    D, Dff, Din, V = cfg["d_model"], cfg["d_ff"], cfg["d_input"], cfg["vocab_size"]
    keys = jax.random.split(key, 4 + cfg["enc_layers"] + cfg["dec_layers"])
    params = {}
    params["emb_w"], params["emb_b"] = _init_linear(keys[0], Din, D)
    params["out_w"], params["out_b"] = _init_linear(keys[1], D, V)
    params["pe"] = sinusoidal_pe(cfg["max_seq_length"], D)

    enc_layers = []
    for li in range(cfg["enc_layers"]):
        k = jax.random.split(keys[2 + li], 3)
        w1, b1 = _init_linear(k[1], D, Dff)
        w2, b2 = _init_linear(k[2], Dff, D)
        enc_layers.append(dict(
            self_attn=_init_self_attn(k[0], D),
            ln1_g=jnp.ones((D,), jnp.float32), ln1_b=jnp.zeros((D,), jnp.float32),
            ln2_g=jnp.ones((D,), jnp.float32), ln2_b=jnp.zeros((D,), jnp.float32),
            w1=w1, b1=b1, w2=w2, b2=b2))
    params["enc_layers"] = enc_layers

    dec_layers = []
    for li in range(cfg["dec_layers"]):
        k = jax.random.split(keys[2 + cfg["enc_layers"] + li], 4)
        w1, b1 = _init_linear(k[2], D, Dff)
        w2, b2 = _init_linear(k[3], Dff, D)
        dec_layers.append(dict(
            self_attn=_init_self_attn(k[0], D),
            cross_attn=_init_cross_attn(k[1], D),
            ln1_g=jnp.ones((D,), jnp.float32), ln1_b=jnp.zeros((D,), jnp.float32),
            ln2_g=jnp.ones((D,), jnp.float32), ln2_b=jnp.zeros((D,), jnp.float32),
            ln3_g=jnp.ones((D,), jnp.float32), ln3_b=jnp.zeros((D,), jnp.float32),
            w1=w1, b1=b1, w2=w2, b2=b2))
    params["dec_layers"] = dec_layers
    return params


# ----------------------------- main -----------------------------

if __name__ == "__main__":
    cfg = dict(
        vocab_size=32,
        max_seq_length=16,
        enc_layers=2,
        dec_layers=2,
        d_model=32,
        d_input=48,
        num_heads=4,
        d_ff=64,
    )
    B, S_src, S_tgt = 2, 8, 8

    key = jax.random.PRNGKey(0)
    kp, ks, kt = jax.random.split(key, 3)
    params = init_params(kp, cfg)

    src = jax.random.normal(ks, (B, S_src, cfg["d_input"]), jnp.float32)
    tgt = jax.random.normal(kt, (B, S_tgt, cfg["d_input"]), jnp.float32)
    # source padding mask: (B, 1, 1, S_src), 1 = attend
    src_masks = jnp.ones((B, 1, 1, S_src), jnp.float32)
    # target causal mask: (B, 1, S_tgt, S_tgt)
    causal = jnp.tril(jnp.ones((S_tgt, S_tgt), jnp.float32))
    tgt_masks = jnp.broadcast_to(causal[None, None], (B, 1, S_tgt, S_tgt))

    # TODO(synk): dropout (p_drop / p_drop_layer) is inference-mode identity here; no RNG dropout masks.
    fwd = jax.jit(functools.partial(transformer_forward, cfg=cfg))
    out = fwd(params, src, tgt, src_masks, tgt_masks)
    jax.block_until_ready(out)
    assert out.shape == (B, S_tgt, cfg["vocab_size"])
    print("KERNEL_OK")
</pallas_src>

<mosaic_0001>
module attributes {stable_mosaic.version = 11 : i64} {
  func.func @_matmul_bias_kernel(%arg0: i32, %arg1: i32, %arg2: memref<16x32xf32, #tpu.memory_space<vmem>>, %arg3: memref<32x96xf32, #tpu.memory_space<vmem>>, %arg4: memref<1x96xf32, #tpu.memory_space<vmem>>, %arg5: memref<16x96xf32, #tpu.memory_space<vmem>>) attributes {dimension_semantics = [#tpu.dimension_semantics<parallel>, #tpu.dimension_semantics<parallel>], iteration_bounds = array<i64: 1, 1>, scalar_prefetch = 0 : i64, scratch_operands = 0 : i64, tpu.core_type = #tpu.core_type<tc>, window_params = [{transform_indices = @transform_0, window_bounds = array<i64: 16, 32>}, {transform_indices = @transform_1, window_bounds = array<i64: 32, 96>}, {transform_indices = @transform_2, window_bounds = array<i64: 1, 96>}, {transform_indices = @transform_3, window_bounds = array<i64: 16, 96>}]} {
    %c0 = arith.constant 0 : index
    %c0_0 = arith.constant 0 : index
    %0 = vector.load %arg2[%c0, %c0_0] : memref<16x32xf32, #tpu.memory_space<vmem>>, vector<16x32xf32>
    %c0_1 = arith.constant 0 : index
    %c0_2 = arith.constant 0 : index
    %1 = vector.load %arg3[%c0_1, %c0_2] : memref<32x96xf32, #tpu.memory_space<vmem>>, vector<32x96xf32>
    %cst = arith.constant dense<0.000000e+00> : vector<16x96xf32>
    %2 = tpu.matmul %0, %1, %cst {dimension_numbers = #tpu.dot_dimension_numbers<[1], [0], [0], [1], [0, 0, 1, 1], [], []>} : vector<16x32xf32>, vector<32x96xf32>, vector<16x96xf32> -> vector<16x96xf32>
    %c0_3 = arith.constant 0 : index
    %c0_4 = arith.constant 0 : index
    %3 = vector.load %arg4[%c0_3, %c0_4] : memref<1x96xf32, #tpu.memory_space<vmem>>, vector<1x96xf32>
    %4 = vector.broadcast %3 : vector<1x96xf32> to vector<16x96xf32>
    %5 = arith.addf %2, %4 : vector<16x96xf32>
    %c0_5 = arith.constant 0 : index
    %c0_6 = arith.constant 0 : index
    %6 = vector.load %arg5[%c0_5, %c0_6] : memref<16x96xf32, #tpu.memory_space<vmem>>, vector<16x96xf32>
    tpu.vector_store %arg5[%c0_5, %c0_6], %5 {strides = array<i32>} : memref<16x96xf32, #tpu.memory_space<vmem>>, vector<16x96xf32>,
    return
  }
  func.func @transform_0(%arg0: i32, %arg1: i32) -> (i32, i32) {
    %c0_i32 = arith.constant 0 : i32
    %c0_i32_0 = arith.constant 0 : i32
    return %arg0, %c0_i32 : i32, i32
  }
  func.func @transform_1(%arg0: i32, %arg1: i32) -> (i32, i32) {
    %c0_i32 = arith.constant 0 : i32
    %c0_i32_0 = arith.constant 0 : i32
    return %c0_i32, %arg1 : i32, i32
  }
  func.func @transform_2(%arg0: i32, %arg1: i32) -> (i32, i32) {
    %c0_i32 = arith.constant 0 : i32
    %c0_i32_0 = arith.constant 0 : i32
    return %c0_i32, %arg1 : i32, i32
  }
  func.func @transform_3(%arg0: i32, %arg1: i32) -> (i32, i32) {
    %c0_i32 = arith.constant 0 : i32
    return %arg0, %arg1 : i32, i32
  }
}

module attributes {stable_mosaic.version = 11 : i64} {
  func.func @_matmul_bias_kernel(%arg0: i32, %arg1: i32, %arg2: memref<16x48xf32, #tpu.memory_space<vmem>>, %arg3: memref<48x32xf32, #tpu.memory_space<vmem>>, %arg4: memref<1x32xf32, #tpu.memory_space<vmem>>, %arg5: memref<16x32xf32, #tpu.memory_space<vmem>>) attributes {dimension_semantics = [#tpu.dimension_semantics<parallel>, #tpu.dimension_semantics<parallel>], iteration_bounds = array<i64: 1, 1>, scalar_prefetch = 0 : i64, scratch_operands = 0 : i64, tpu.core_type = #tpu.core_type<tc>, window_params = [{transform_indices = @transform_0, window_bounds = array<i64: 16, 48>}, {transform_indices = @transform_1, window_bounds = array<i64: 48, 32>}, {transform_indices = @transform_2, window_bounds = array<i64: 1, 32>}, {transform_indices = @transform_3, window_bounds = array<i64: 16, 32>}]} {
    %c0 = arith.constant 0 : index
    %c0_0 = arith.constant 0 : index
    %0 = vector.load %arg2[%c0, %c0_0] : memref<16x48xf32, #tpu.memory_space<vmem>>, vector<16x48xf32>
    %c0_1 = arith.constant 0 : index
    %c0_2 = arith.constant 0 : index
    %1 = vector.load %arg3[%c0_1, %c0_2] : memref<48x32xf32, #tpu.memory_space<vmem>>, vector<48x32xf32>
    %cst = arith.constant dense<0.000000e+00> : vector<16x32xf32>
    %2 = tpu.matmul %0, %1, %cst {dimension_numbers = #tpu.dot_dimension_numbers<[1], [0], [0], [1], [0, 0, 1, 1], [], []>} : vector<16x48xf32>, vector<48x32xf32>, vector<16x32xf32> -> vector<16x32xf32>
    %c0_3 = arith.constant 0 : index
    %c0_4 = arith.constant 0 : index
    %3 = vector.load %arg4[%c0_3, %c0_4] : memref<1x32xf32, #tpu.memory_space<vmem>>, vector<1x32xf32>
    %4 = vector.broadcast %3 : vector<1x32xf32> to vector<16x32xf32>
    %5 = arith.addf %2, %4 : vector<16x32xf32>
    %c0_5 = arith.constant 0 : index
    %c0_6 = arith.constant 0 : index
    %6 = vector.load %arg5[%c0_5, %c0_6] : memref<16x32xf32, #tpu.memory_space<vmem>>, vector<16x32xf32>
    tpu.vector_store %arg5[%c0_5, %c0_6], %5 {strides = array<i32>} : memref<16x32xf32, #tpu.memory_space<vmem>>, vector<16x32xf32>,
    return
  }
  func.func @transform_0(%arg0: i32, %arg1: i32) -> (i32, i32) {
    %c0_i32 = arith.constant 0 : i32
    %c0_i32_0 = arith.constant 0 : i32
    return %arg0, %c0_i32 : i32, i32
  }
  func.func @transform_1(%arg0: i32, %arg1: i32) -> (i32, i32) {
    %c0_i32 = arith.constant 0 : i32
    %c0_i32_0 = arith.constant 0 : i32
    return %c0_i32, %arg1 : i32, i32
  }
  func.func @transform_2(%arg0: i32, %arg1: i32) -> (i32, i32) {
    %c0_i32 = arith.constant 0 : i32
    %c0_i32_0 = arith.constant 0 : i32
    return %c0_i32, %arg1 : i32, i32
  }
  func.func @transform_3(%arg0: i32, %arg1: i32) -> (i32, i32) {
    %c0_i32 = arith.constant 0 : i32
    return %arg0, %arg1 : i32, i32
  }
}

module attributes {stable_mosaic.version = 11 : i64} {
  func.func @_mha_kernel(%arg0: i32, %arg1: memref<1x8x32xf32, #tpu.memory_space<vmem>>, %arg2: memref<1x8x32xf32, #tpu.memory_space<vmem>>, %arg3: memref<1x8x32xf32, #tpu.memory_space<vmem>>, %arg4: memref<1x8x8xf32, #tpu.memory_space<vmem>>, %arg5: memref<1x8x32xf32, #tpu.memory_space<vmem>>) attributes {dimension_semantics = [#tpu.dimension_semantics<parallel>], iteration_bounds = array<i64: 2>, scalar_prefetch = 0 : i64, scratch_operands = 0 : i64, tpu.core_type = #tpu.core_type<tc>, window_params = [{transform_indices = @transform_0, window_bounds = array<i64: 1, 8, 32>}, {transform_indices = @transform_1, window_bounds = array<i64: 1, 8, 32>}, {transform_indices = @transform_2, window_bounds = array<i64: 1, 8, 32>}, {transform_indices = @transform_3, window_bounds = array<i64: 1, 8, 8>}, {transform_indices = @transform_4, window_bounds = array<i64: 1, 8, 32>}]} {
    %c0 = arith.constant 0 : index
    %c0_0 = arith.constant 0 : index
    %c0_1 = arith.constant 0 : index
    %0 = vector.load %arg1[%c0, %c0_0, %c0_1] : memref<1x8x32xf32, #tpu.memory_space<vmem>>, vector<1x8x32xf32>
    %1 = vector.shape_cast %0 : vector<1x8x32xf32> to vector<8x32xf32>
    %c0_2 = arith.constant 0 : index
    %c0_3 = arith.constant 0 : index
    %c0_4 = arith.constant 0 : index
    %2 = vector.load %arg2[%c0_2, %c0_3, %c0_4] : memref<1x8x32xf32, #tpu.memory_space<vmem>>, vector<1x8x32xf32>
    %3 = vector.shape_cast %2 : vector<1x8x32xf32> to vector<8x32xf32>
    %c0_5 = arith.constant 0 : index
    %c0_6 = arith.constant 0 : index
    %c0_7 = arith.constant 0 : index
    %4 = vector.load %arg3[%c0_5, %c0_6, %c0_7] : memref<1x8x32xf32, #tpu.memory_space<vmem>>, vector<1x8x32xf32>
    %5 = vector.shape_cast %4 : vector<1x8x32xf32> to vector<8x32xf32>
    %c0_8 = arith.constant 0 : index
    %c0_9 = arith.constant 0 : index
    %c0_10 = arith.constant 0 : index
    %6 = vector.load %arg4[%c0_8, %c0_9, %c0_10] : memref<1x8x8xf32, #tpu.memory_space<vmem>>, vector<1x8x8xf32>
    %7 = vector.shape_cast %6 : vector<1x8x8xf32> to vector<8x8xf32>
    %cst = arith.constant 0.000000e+00 : f32
    %8 = vector.broadcast %cst : f32 to vector<8x8xf32>
    %9 = arith.cmpf ogt, %7, %8 : vector<8x8xf32>
    %10 = vector.extract_strided_slice %1 {offsets = [0, 0], sizes = [8, 8], strides = [1, 1]} : vector<8x32xf32> to vector<8x8xf32>
    %11 = vector.extract_strided_slice %3 {offsets = [0, 0], sizes = [8, 8], strides = [1, 1]} : vector<8x32xf32> to vector<8x8xf32>
    %12 = vector.extract_strided_slice %5 {offsets = [0, 0], sizes = [8, 8], strides = [1, 1]} : vector<8x32xf32> to vector<8x8xf32>
    %cst_11 = arith.constant dense<0.000000e+00> : vector<8x8xf32>
    %13 = tpu.matmul %10, %11, %cst_11 {dimension_numbers = #tpu.dot_dimension_numbers<[1], [1], [0], [0], [0, 0, 1, 0], [], []>} : vector<8x8xf32>, vector<8x8xf32>, vector<8x8xf32> -> vector<8x8xf32>
    %cst_12 = arith.constant 0.353553385 : f32
    %14 = vector.broadcast %cst_12 : f32 to vector<8x8xf32>
    %15 = arith.mulf %13, %14 : vector<8x8xf32>
    %cst_13 = arith.constant -1.000000e+09 : f32
    %16 = vector.broadcast %cst_13 : f32 to vector<8x8xf32>
    %17 = arith.select %9, %15, %16 : vector<8x8xi1>, vector<8x8xf32>
    %cst_14 = arith.constant dense<0xFF800000> : vector<8xf32>
    %18 = vector.multi_reduction <maximumf>, %17, %cst_14 [1] : vector<8x8xf32> to vector<8xf32>
    %19 = vector.shape_cast %18 : vector<8xf32> to vector<8x1xf32>
    %20 = vector.broadcast %19 : vector<8x1xf32> to vector<8x8xf32>
    %21 = arith.subf %17, %20 : vector<8x8xf32>
    %22 = math.exp %21 : vector<8x8xf32>
    %cst_15 = arith.constant dense<0.000000e+00> : vector<8xf32>
    %23 = vector.multi_reduction <add>, %22, %cst_15 [1] : vector<8x8xf32> to vector<8xf32>
    %24 = vector.shape_cast %23 : vector<8xf32> to vector<8x1xf32>
    %25 = tpu.reciprocal %24 {approx = true} : vector<8x1xf32> -> vector<8x1xf32>
    %26 = vector.broadcast %25 : vector<8x1xf32> to vector<8x8xf32>
    %27 = arith.mulf %22, %26 : vector<8x8xf32>
    %cst_16 = arith.constant dense<0.000000e+00> : vector<8x8xf32>
    %28 = tpu.matmul %27, %12, %cst_16 {dimension_numbers = #tpu.dot_dimension_numbers<[1], [0], [0], [1], [0, 0, 1, 1], [], []>} : vector<8x8xf32>, vector<8x8xf32>, vector<8x8xf32> -> vector<8x8xf32>
    %29 = vector.extract_strided_slice %1 {offsets = [0, 8], sizes = [8, 8], strides = [1, 1]} : vector<8x32xf32> to vector<8x8xf32>
    %30 = vector.extract_strided_slice %3 {offsets = [0, 8], sizes = [8, 8], strides = [1, 1]} : vector<8x32xf32> to vector<8x8xf32>
    %31 = vector.extract_strided_slice %5 {offsets = [0, 8], sizes = [8, 8], strides = [1, 1]} : vector<8x32xf32> to vector<8x8xf32>
    %cst_17 = arith.constant dense<0.000000e+00> : vector<8x8xf32>
    %32 = tpu.matmul %29, %30, %cst_17 {dimension_numbers = #tpu.dot_dimension_numbers<[1], [1], [0], [0], [0, 0, 1, 0], [], []>} : vector<8x8xf32>, vector<8x8xf32>, vector<8x8xf32> -> vector<8x8xf32>
    %cst_18 = arith.constant 0.353553385 : f32
    %33 = vector.broadcast %cst_18 : f32 to vector<8x8xf32>
    %34 = arith.mulf %32, %33 : vector<8x8xf32>
    %cst_19 = arith.constant -1.000000e+09 : f32
    %35 = vector.broadcast %cst_19 : f32 to vector<8x8xf32>
    %36 = arith.select %9, %34, %35 : vector<8x8xi1>, vector<8x8xf32>
    %cst_20 = arith.constant dense<0xFF800000> : vector<8xf32>
    %37 = vector.multi_reduction <maximumf>, %36, %cst_20 [1] : vector<8x8xf32> to vector<8xf32>
    %38 = vector.shape_cast %37 : vector<8xf32> to vector<8x1xf32>
    %39 = vector.broadcast %38 : vector<8x1xf32> to vector<8x8xf32>
    %40 = arith.subf %36, %39 : vector<8x8xf32>
    %41 = math.exp %40 : vector<8x8xf32>
    %cst_21 = arith.constant dense<0.000000e+00> : vector<8xf32>
    %42 = vector.multi_reduction <add>, %41, %cst_21 [1] : vector<8x8xf32> to vector<8xf32>
    %43 = vector.shape_cast %42 : vector<8xf32> to vector<8x1xf32>
    %44 = tpu.reciprocal %43 {approx = true} : vector<8x1xf32> -> vector<8x1xf32>
    %45 = vector.broadcast %44 : vector<8x1xf32> to vector<8x8xf32>
    %46 = arith.mulf %41, %45 : vector<8x8xf32>
    %cst_22 = arith.constant dense<0.000000e+00> : vector<8x8xf32>
    %47 = tpu.matmul %46, %31, %cst_22 {dimension_numbers = #tpu.dot_dimension_numbers<[1], [0], [0], [1], [0, 0, 1, 1], [], []>} : vector<8x8xf32>, vector<8x8xf32>, vector<8x8xf32> -> vector<8x8xf32>
    %48 = vector.extract_strided_slice %1 {offsets = [0, 16], sizes = [8, 8], strides = [1, 1]} : vector<8x32xf32> to vector<8x8xf32>
    %49 = vector.extract_strided_slice %3 {offsets = [0, 16], sizes = [8, 8], strides = [1, 1]} : vector<8x32xf32> to vector<8x8xf32>
    %50 = vector.extract_strided_slice %5 {offsets = [0, 16], sizes = [8, 8], strides = [1, 1]} : vector<8x32xf32> to vector<8x8xf32>
    %cst_23 = arith.constant dense<0.000000e+00> : vector<8x8xf32>
    %51 = tpu.matmul %48, %49, %cst_23 {dimension_numbers = #tpu.dot_dimension_numbers<[1], [1], [0], [0], [0, 0, 1, 0], [], []>} : vector<8x8xf32>, vector<8x8xf32>, vector<8x8xf32> -> vector<8x8xf32>
    %cst_24 = arith.constant 0.353553385 : f32
    %52 = vector.broadcast %cst_24 : f32 to vector<8x8xf32>
    %53 = arith.mulf %51, %52 : vector<8x8xf32>
    %cst_25 = arith.constant -1.000000e+09 : f32
    %54 = vector.broadcast %cst_25 : f32 to vector<8x8xf32>
    %55 = arith.select %9, %53, %54 : vector<8x8xi1>, vector<8x8xf32>
    %cst_26 = arith.constant dense<0xFF800000> : vector<8xf32>
    %56 = vector.multi_reduction <maximumf>, %55, %cst_26 [1] : vector<8x8xf32> to vector<8xf32>
    %57 = vector.shape_cast %56 : vector<8xf32> to vector<8x1xf32>
    %58 = vector.broadcast %57 : vector<8x1xf32> to vector<8x8xf32>
    %59 = arith.subf %55, %58 : vector<8x8xf32>
    %60 = math.exp %59 : vector<8x8xf32>
    %cst_27 = arith.constant dense<0.000000e+00> : vector<8xf32>
    %61 = vector.multi_reduction <add>, %60, %cst_27 [1] : vector<8x8xf32> to vector<8xf32>
    %62 = vector.shape_cast %61 : vector<8xf32> to vector<8x1xf32>
    %63 = tpu.reciprocal %62 {approx = true} : vector<8x1xf32> -> vector<8x1xf32>
    %64 = vector.broadcast %63 : vector<8x1xf32> to vector<8x8xf32>
    %65 = arith.mulf %60, %64 : vector<8x8xf32>
    %cst_28 = arith.constant dense<0.000000e+00> : vector<8x8xf32>
    %66 = tpu.matmul %65, %50, %cst_28 {dimension_numbers = #tpu.dot_dimension_numbers<[1], [0], [0], [1], [0, 0, 1, 1], [], []>} : vector<8x8xf32>, vector<8x8xf32>, vector<8x8xf32> -> vector<8x8xf32>
    %67 = vector.extract_strided_slice %1 {offsets = [0, 24], sizes = [8, 8], strides = [1, 1]} : vector<8x32xf32> to vector<8x8xf32>
    %68 = vector.extract_strided_slice %3 {offsets = [0, 24], sizes = [8, 8], strides = [1, 1]} : vector<8x32xf32> to vector<8x8xf32>
    %69 = vector.extract_strided_slice %5 {offsets = [0, 24], sizes = [8, 8], strides = [1, 1]} : vector<8x32xf32> to vector<8x8xf32>
    %cst_29 = arith.constant dense<0.000000e+00> : vector<8x8xf32>
    %70 = tpu.matmul %67, %68, %cst_29 {dimension_numbers = #tpu.dot_dimension_numbers<[1], [1], [0], [0], [0, 0, 1, 0], [], []>} : vector<8x8xf32>, vector<8x8xf32>, vector<8x8xf32> -> vector<8x8xf32>
    %cst_30 = arith.constant 0.353553385 : f32
    %71 = vector.broadcast %cst_30 : f32 to vector<8x8xf32>
    %72 = arith.mulf %70, %71 : vector<8x8xf32>
    %cst_31 = arith.constant -1.000000e+09 : f32
    %73 = vector.broadcast %cst_31 : f32 to vector<8x8xf32>
    %74 = arith.select %9, %72, %73 : vector<8x8xi1>, vector<8x8xf32>
    %cst_32 = arith.constant dense<0xFF800000> : vector<8xf32>
    %75 = vector.multi_reduction <maximumf>, %74, %cst_32 [1] : vector<8x8xf32> to vector<8xf32>
    %76 = vector.shape_cast %75 : vector<8xf32> to vector<8x1xf32>
    %77 = vector.broadcast %76 : vector<8x1xf32> to vector<8x8xf32>
    %78 = arith.subf %74, %77 : vector<8x8xf32>
    %79 = math.exp %78 : vector<8x8xf32>
    %cst_33 = arith.constant dense<0.000000e+00> : vector<8xf32>
    %80 = vector.multi_reduction <add>, %79, %cst_33 [1] : vector<8x8xf32> to vector<8xf32>
    %81 = vector.shape_cast %80 : vector<8xf32> to vector<8x1xf32>
    %82 = tpu.reciprocal %81 {approx = true} : vector<8x1xf32> -> vector<8x1xf32>
    %83 = vector.broadcast %82 : vector<8x1xf32> to vector<8x8xf32>
    %84 = arith.mulf %79, %83 : vector<8x8xf32>
    %cst_34 = arith.constant dense<0.000000e+00> : vector<8x8xf32>
    %85 = tpu.matmul %84, %69, %cst_34 {dimension_numbers = #tpu.dot_dimension_numbers<[1], [0], [0], [1], [0, 0, 1, 1], [], []>} : vector<8x8xf32>, vector<8x8xf32>, vector<8x8xf32> -> vector<8x8xf32>
    %86 = tpu.concatenate %28, %47, %66, %85 in 1 : vector<8x8xf32>, vector<8x8xf32>, vector<8x8xf32>, vector<8x8xf32> -> vector<8x32xf32>
    %c0_35 = arith.constant 0 : index
    %c0_36 = arith.constant 0 : index
    %c0_37 = arith.constant 0 : index
    %87 = vector.load %arg5[%c0_35, %c0_36, %c0_37] : memref<1x8x32xf32, #tpu.memory_space<vmem>>, vector<1x8x32xf32>
    %88 = vector.shape_cast %87 : vector<1x8x32xf32> to vector<8x32xf32>
    %89 = vector.shape_cast %86 : vector<8x32xf32> to vector<1x8x32xf32>
    tpu.vector_store %arg5[%c0_35, %c0_36, %c0_37], %89 {strides = array<i32>} : memref<1x8x32xf32, #tpu.memory_space<vmem>>, vector<1x8x32xf32>,
    return
  }
  func.func @transform_0(%arg0: i32) -> (i32, i32, i32) {
    %c0_i32 = arith.constant 0 : i32
    %c0_i32_0 = arith.constant 0 : i32
    %c0_i32_1 = arith.constant 0 : i32
    return %arg0, %c0_i32, %c0_i32_0 : i32, i32, i32
  }
  func.func @transform_1(%arg0: i32) -> (i32, i32, i32) {
    %c0_i32 = arith.constant 0 : i32
    %c0_i32_0 = arith.constant 0 : i32
    %c0_i32_1 = arith.constant 0 : i32
    return %arg0, %c0_i32, %c0_i32_0 : i32, i32, i32
  }
  func.func @transform_2(%arg0: i32) -> (i32, i32, i32) {
    %c0_i32 = arith.constant 0 : i32
    %c0_i32_0 = arith.constant 0 : i32
    %c0_i32_1 = arith.constant 0 : i32
    return %arg0, %c0_i32, %c0_i32_0 : i32, i32, i32
  }
  func.func @transform_3(%arg0: i32) -> (i32, i32, i32) {
    %c0_i32 = arith.constant 0 : i32
    %c0_i32_0 = arith.constant 0 : i32
    %c0_i32_1 = arith.constant 0 : i32
    return %arg0, %c0_i32, %c0_i32_0 : i32, i32, i32
  }
  func.func @transform_4(%arg0: i32) -> (i32, i32, i32) {
    %c0_i32 = arith.constant 0 : i32
    %c0_i32_0 = arith.constant 0 : i32
    %c0_i32_1 = arith.constant 0 : i32
    return %arg0, %c0_i32, %c0_i32_0 : i32, i32, i32
  }
}

module attributes {stable_mosaic.version = 11 : i64} {
  func.func @_proj_add_ln_kernel(%arg0: i32, %arg1: memref<16x32xf32, #tpu.memory_space<vmem>>, %arg2: memref<32x32xf32, #tpu.memory_space<vmem>>, %arg3: memref<1x32xf32, #tpu.memory_space<vmem>>, %arg4: memref<16x32xf32, #tpu.memory_space<vmem>>, %arg5: memref<1x32xf32, #tpu.memory_space<vmem>>, %arg6: memref<1x32xf32, #tpu.memory_space<vmem>>, %arg7: memref<16x32xf32, #tpu.memory_space<vmem>>) attributes {dimension_semantics = [#tpu.dimension_semantics<parallel>], iteration_bounds = array<i64: 1>, scalar_prefetch = 0 : i64, scratch_operands = 0 : i64, tpu.core_type = #tpu.core_type<tc>, window_params = [{transform_indices = @transform_0, window_bounds = array<i64: 16, 32>}, {pipeline_mode = #tpu.pipeline_mode<synchronous>, transform_indices = @transform_1, window_bounds = array<i64: 32, 32>}, {pipeline_mode = #tpu.pipeline_mode<synchronous>, transform_indices = @transform_2, window_bounds = array<i64: 1, 32>}, {transform_indices = @transform_3, window_bounds = array<i64: 16, 32>}, {pipeline_mode = #tpu.pipeline_mode<synchronous>, transform_indices = @transform_4, window_bounds = array<i64: 1, 32>}, {pipeline_mode = #tpu.pipeline_mode<synchronous>, transform_indices = @transform_5, window_bounds = array<i64: 1, 32>}, {transform_indices = @transform_6, window_bounds = array<i64: 16, 32>}]} {
    %c0 = arith.constant 0 : index
    %c0_0 = arith.constant 0 : index
    %0 = vector.load %arg1[%c0, %c0_0] : memref<16x32xf32, #tpu.memory_space<vmem>>, vector<16x32xf32>
    %c0_1 = arith.constant 0 : index
    %c0_2 = arith.constant 0 : index
    %1 = vector.load %arg2[%c0_1, %c0_2] : memref<32x32xf32, #tpu.memory_space<vmem>>, vector<32x32xf32>
    %cst = arith.constant dense<0.000000e+00> : vector<16x32xf32>
    %2 = tpu.matmul %0, %1, %cst {dimension_numbers = #tpu.dot_dimension_numbers<[1], [0], [0], [1], [0, 0, 1, 1], [], []>} : vector<16x32xf32>, vector<32x32xf32>, vector<16x32xf32> -> vector<16x32xf32>
    %c0_3 = arith.constant 0 : index
    %c0_4 = arith.constant 0 : index
    %3 = vector.load %arg3[%c0_3, %c0_4] : memref<1x32xf32, #tpu.memory_space<vmem>>, vector<1x32xf32>
    %4 = vector.broadcast %3 : vector<1x32xf32> to vector<16x32xf32>
    %5 = arith.addf %2, %4 : vector<16x32xf32>
    %c0_5 = arith.constant 0 : index
    %c0_6 = arith.constant 0 : index
    %6 = vector.load %arg4[%c0_5, %c0_6] : memref<16x32xf32, #tpu.memory_space<vmem>>, vector<16x32xf32>
    %7 = arith.addf %5, %6 : vector<16x32xf32>
    %c0_7 = arith.constant 0 : index
    %c0_8 = arith.constant 0 : index
    %8 = vector.load %arg5[%c0_7, %c0_8] : memref<1x32xf32, #tpu.memory_space<vmem>>, vector<1x32xf32>
    %c0_9 = arith.constant 0 : index
    %c0_10 = arith.constant 0 : index
    %9 = vector.load %arg6[%c0_9, %c0_10] : memref<1x32xf32, #tpu.memory_space<vmem>>, vector<1x32xf32>
    %cst_11 = arith.constant dense<0.000000e+00> : vector<16xf32>
    %10 = vector.multi_reduction <add>, %7, %cst_11 [1] : vector<16x32xf32> to vector<16xf32>
    %11 = vector.shape_cast %10 : vector<16xf32> to vector<16x1xf32>
    %cst_12 = arith.constant 3.200000e+01 : f32
    %12 = vector.broadcast %cst_12 : f32 to vector<16x1xf32>
    %13 = arith.divf %11, %12 : vector<16x1xf32>
    %14 = vector.broadcast %13 : vector<16x1xf32> to vector<16x32xf32>
    %15 = arith.subf %7, %14 : vector<16x32xf32>
    %16 = arith.mulf %15, %15 : vector<16x32xf32>
    %cst_13 = arith.constant dense<0.000000e+00> : vector<16xf32>
    %17 = vector.multi_reduction <add>, %16, %cst_13 [1] : vector<16x32xf32> to vector<16xf32>
    %18 = vector.shape_cast %17 : vector<16xf32> to vector<16x1xf32>
    %cst_14 = arith.constant 3.200000e+01 : f32
    %19 = vector.broadcast %cst_14 : f32 to vector<16x1xf32>
    %20 = arith.divf %18, %19 : vector<16x1xf32>
    %21 = vector.broadcast %13 : vector<16x1xf32> to vector<16x32xf32>
    %22 = arith.subf %7, %21 : vector<16x32xf32>
    %cst_15 = arith.constant 9.99999974E-6 : f32
    %23 = vector.broadcast %cst_15 : f32 to vector<16x1xf32>
    %24 = arith.addf %20, %23 : vector<16x1xf32>
    %25 = math.rsqrt %24 : vector<16x1xf32>
    %26 = vector.broadcast %25 : vector<16x1xf32> to vector<16x32xf32>
    %27 = arith.mulf %22, %26 : vector<16x32xf32>
    %28 = vector.broadcast %8 : vector<1x32xf32> to vector<16x32xf32>
    %29 = arith.mulf %27, %28 : vector<16x32xf32>
    %30 = vector.broadcast %9 : vector<1x32xf32> to vector<16x32xf32>
    %31 = arith.addf %29, %30 : vector<16x32xf32>
    %c0_16 = arith.constant 0 : index
    %c0_17 = arith.constant 0 : index
    %32 = vector.load %arg7[%c0_16, %c0_17] : memref<16x32xf32, #tpu.memory_space<vmem>>, vector<16x32xf32>
    tpu.vector_store %arg7[%c0_16, %c0_17], %31 {strides = array<i32>} : memref<16x32xf32, #tpu.memory_space<vmem>>, vector<16x32xf32>,
    return
  }
  func.func @transform_0(%arg0: i32) -> (i32, i32) {
    %c0_i32 = arith.constant 0 : i32
    %c0_i32_0 = arith.constant 0 : i32
    return %arg0, %c0_i32 : i32, i32
  }
  func.func @transform_1(%arg0: i32) -> (i32, i32) {
    %c0_i32 = arith.constant 0 : i32
    %c0_i32_0 = arith.constant 0 : i32
    %c0_i32_1 = arith.constant 0 : i32
    return %c0_i32, %c0_i32_0 : i32, i32
  }
  func.func @transform_2(%arg0: i32) -> (i32, i32) {
    %c0_i32 = arith.constant 0 : i32
    %c0_i32_0 = arith.constant 0 : i32
    %c0_i32_1 = arith.constant 0 : i32
    return %c0_i32, %c0_i32_0 : i32, i32
  }
  func.func @transform_3(%arg0: i32) -> (i32, i32) {
    %c0_i32 = arith.constant 0 : i32
    %c0_i32_0 = arith.constant 0 : i32
    return %arg0, %c0_i32 : i32, i32
  }
  func.func @transform_4(%arg0: i32) -> (i32, i32) {
    %c0_i32 = arith.constant 0 : i32
    %c0_i32_0 = arith.constant 0 : i32
    %c0_i32_1 = arith.constant 0 : i32
    return %c0_i32, %c0_i32_0 : i32, i32
  }
  func.func @transform_5(%arg0: i32) -> (i32, i32) {
    %c0_i32 = arith.constant 0 : i32
    %c0_i32_0 = arith.constant 0 : i32
    %c0_i32_1 = arith.constant 0 : i32
    return %c0_i32, %c0_i32_0 : i32, i32
  }
  func.func @transform_6(%arg0: i32) -> (i32, i32) {
    %c0_i32 = arith.constant 0 : i32
    %c0_i32_0 = arith.constant 0 : i32
    return %arg0, %c0_i32 : i32, i32
  }
}

module attributes {stable_mosaic.version = 11 : i64} {
  func.func @_matmul_bias_kernel(%arg0: i32, %arg1: i32, %arg2: memref<16x32xf32, #tpu.memory_space<vmem>>, %arg3: memref<32x32xf32, #tpu.memory_space<vmem>>, %arg4: memref<1x32xf32, #tpu.memory_space<vmem>>, %arg5: memref<16x32xf32, #tpu.memory_space<vmem>>) attributes {dimension_semantics = [#tpu.dimension_semantics<parallel>, #tpu.dimension_semantics<parallel>], iteration_bounds = array<i64: 1, 1>, scalar_prefetch = 0 : i64, scratch_operands = 0 : i64, tpu.core_type = #tpu.core_type<tc>, window_params = [{transform_indices = @transform_0, window_bounds = array<i64: 16, 32>}, {transform_indices = @transform_1, window_bounds = array<i64: 32, 32>}, {transform_indices = @transform_2, window_bounds = array<i64: 1, 32>}, {transform_indices = @transform_3, window_bounds = array<i64: 16, 32>}]} {
    %c0 = arith.constant 0 : index
    %c0_0 = arith.constant 0 : index
    %0 = vector.load %arg2[%c0, %c0_0] : memref<16x32xf32, #tpu.memory_space<vmem>>, vector<16x32xf32>
    %c0_1 = arith.constant 0 : index
    %c0_2 = arith.constant 0 : index
    %1 = vector.load %arg3[%c0_1, %c0_2] : memref<32x32xf32, #tpu.memory_space<vmem>>, vector<32x32xf32>
    %cst = arith.constant dense<0.000000e+00> : vector<16x32xf32>
    %2 = tpu.matmul %0, %1, %cst {dimension_numbers = #tpu.dot_dimension_numbers<[1], [0], [0], [1], [0, 0, 1, 1], [], []>} : vector<16x32xf32>, vector<32x32xf32>, vector<16x32xf32> -> vector<16x32xf32>
    %c0_3 = arith.constant 0 : index
    %c0_4 = arith.constant 0 : index
    %3 = vector.load %arg4[%c0_3, %c0_4] : memref<1x32xf32, #tpu.memory_space<vmem>>, vector<1x32xf32>
    %4 = vector.broadcast %3 : vector<1x32xf32> to vector<16x32xf32>
    %5 = arith.addf %2, %4 : vector<16x32xf32>
    %c0_5 = arith.constant 0 : index
    %c0_6 = arith.constant 0 : index
    %6 = vector.load %arg5[%c0_5, %c0_6] : memref<16x32xf32, #tpu.memory_space<vmem>>, vector<16x32xf32>
    tpu.vector_store %arg5[%c0_5, %c0_6], %5 {strides = array<i32>} : memref<16x32xf32, #tpu.memory_space<vmem>>, vector<16x32xf32>,
    return
  }
  func.func @transform_0(%arg0: i32, %arg1: i32) -> (i32, i32) {
    %c0_i32 = arith.constant 0 : i32
    %c0_i32_0 = arith.constant 0 : i32
    return %arg0, %c0_i32 : i32, i32
  }
  func.func @transform_1(%arg0: i32, %arg1: i32) -> (i32, i32) {
    %c0_i32 = arith.constant 0 : i32
    %c0_i32_0 = arith.constant 0 : i32
    return %c0_i32, %arg1 : i32, i32
  }
  func.func @transform_2(%arg0: i32, %arg1: i32) -> (i32, i32) {
    %c0_i32 = arith.constant 0 : i32
    %c0_i32_0 = arith.constant 0 : i32
    return %c0_i32, %arg1 : i32, i32
  }
  func.func @transform_3(%arg0: i32, %arg1: i32) -> (i32, i32) {
    %c0_i32 = arith.constant 0 : i32
    return %arg0, %arg1 : i32, i32
  }
}

module attributes {stable_mosaic.version = 11 : i64} {
  func.func @_mha_kernel(%arg0: i32, %arg1: memref<1x8x32xf32, #tpu.memory_space<vmem>>, %arg2: memref<1x8x32xf32, #tpu.memory_space<vmem>>, %arg3: memref<1x8x32xf32, #tpu.memory_space<vmem>>, %arg4: memref<1x1x8xf32, #tpu.memory_space<vmem>>, %arg5: memref<1x8x32xf32, #tpu.memory_space<vmem>>) attributes {dimension_semantics = [#tpu.dimension_semantics<parallel>], iteration_bounds = array<i64: 2>, scalar_prefetch = 0 : i64, scratch_operands = 0 : i64, tpu.core_type = #tpu.core_type<tc>, window_params = [{transform_indices = @transform_0, window_bounds = array<i64: 1, 8, 32>}, {transform_indices = @transform_1, window_bounds = array<i64: 1, 8, 32>}, {transform_indices = @transform_2, window_bounds = array<i64: 1, 8, 32>}, {transform_indices = @transform_3, window_bounds = array<i64: 1, 1, 8>}, {transform_indices = @transform_4, window_bounds = array<i64: 1, 8, 32>}]} {
    %c0 = arith.constant 0 : index
    %c0_0 = arith.constant 0 : index
    %c0_1 = arith.constant 0 : index
    %0 = vector.load %arg1[%c0, %c0_0, %c0_1] : memref<1x8x32xf32, #tpu.memory_space<vmem>>, vector<1x8x32xf32>
    %1 = vector.shape_cast %0 : vector<1x8x32xf32> to vector<8x32xf32>
    %c0_2 = arith.constant 0 : index
    %c0_3 = arith.constant 0 : index
    %c0_4 = arith.constant 0 : index
    %2 = vector.load %arg2[%c0_2, %c0_3, %c0_4] : memref<1x8x32xf32, #tpu.memory_space<vmem>>, vector<1x8x32xf32>
    %3 = vector.shape_cast %2 : vector<1x8x32xf32> to vector<8x32xf32>
    %c0_5 = arith.constant 0 : index
    %c0_6 = arith.constant 0 : index
    %c0_7 = arith.constant 0 : index
    %4 = vector.load %arg3[%c0_5, %c0_6, %c0_7] : memref<1x8x32xf32, #tpu.memory_space<vmem>>, vector<1x8x32xf32>
    %5 = vector.shape_cast %4 : vector<1x8x32xf32> to vector<8x32xf32>
    %c0_8 = arith.constant 0 : index
    %c0_9 = arith.constant 0 : index
    %c0_10 = arith.constant 0 : index
    %6 = vector.load %arg4[%c0_8, %c0_9, %c0_10] : memref<1x1x8xf32, #tpu.memory_space<vmem>>, vector<1x1x8xf32>
    %7 = vector.shape_cast %6 : vector<1x1x8xf32> to vector<1x8xf32>
    %cst = arith.constant 0.000000e+00 : f32
    %8 = vector.broadcast %cst : f32 to vector<1x8xf32>
    %9 = arith.cmpf ogt, %7, %8 : vector<1x8xf32>
    %10 = vector.extract_strided_slice %1 {offsets = [0, 0], sizes = [8, 8], strides = [1, 1]} : vector<8x32xf32> to vector<8x8xf32>
    %11 = vector.extract_strided_slice %3 {offsets = [0, 0], sizes = [8, 8], strides = [1, 1]} : vector<8x32xf32> to vector<8x8xf32>
    %12 = vector.extract_strided_slice %5 {offsets = [0, 0], sizes = [8, 8], strides = [1, 1]} : vector<8x32xf32> to vector<8x8xf32>
    %cst_11 = arith.constant dense<0.000000e+00> : vector<8x8xf32>
    %13 = tpu.matmul %10, %11, %cst_11 {dimension_numbers = #tpu.dot_dimension_numbers<[1], [1], [0], [0], [0, 0, 1, 0], [], []>} : vector<8x8xf32>, vector<8x8xf32>, vector<8x8xf32> -> vector<8x8xf32>
    %cst_12 = arith.constant 0.353553385 : f32
    %14 = vector.broadcast %cst_12 : f32 to vector<8x8xf32>
    %15 = arith.mulf %13, %14 : vector<8x8xf32>
    %cst_13 = arith.constant -1.000000e+09 : f32
    %16 = vector.shape_cast %9 : vector<1x8xi1> to vector<1x8xi1>
    %17 = vector.broadcast %16 : vector<1x8xi1> to vector<8x8xi1>
    %18 = vector.broadcast %cst_13 : f32 to vector<8x8xf32>
    %19 = arith.select %17, %15, %18 : vector<8x8xi1>, vector<8x8xf32>
    %cst_14 = arith.constant dense<0xFF800000> : vector<8xf32>
    %20 = vector.multi_reduction <maximumf>, %19, %cst_14 [1] : vector<8x8xf32> to vector<8xf32>
    %21 = vector.shape_cast %20 : vector<8xf32> to vector<8x1xf32>
    %22 = vector.broadcast %21 : vector<8x1xf32> to vector<8x8xf32>
    %23 = arith.subf %19, %22 : vector<8x8xf32>
    %24 = math.exp %23 : vector<8x8xf32>
    %cst_15 = arith.constant dense<0.000000e+00> : vector<8xf32>
    %25 = vector.multi_reduction <add>, %24, %cst_15 [1] : vector<8x8xf32> to vector<8xf32>
    %26 = vector.shape_cast %25 : vector<8xf32> to vector<8x1xf32>
    %27 = tpu.reciprocal %26 {approx = true} : vector<8x1xf32> -> vector<8x1xf32>
    %28 = vector.broadcast %27 : vector<8x1xf32> to vector<8x8xf32>
    %29 = arith.mulf %24, %28 : vector<8x8xf32>
    %cst_16 = arith.constant dense<0.000000e+00> : vector<8x8xf32>
    %30 = tpu.matmul %29, %12, %cst_16 {dimension_numbers = #tpu.dot_dimension_numbers<[1], [0], [0], [1], [0, 0, 1, 1], [], []>} : vector<8x8xf32>, vector<8x8xf32>, vector<8x8xf32> -> vector<8x8xf32>
    %31 = vector.extract_strided_slice %1 {offsets = [0, 8], sizes = [8, 8], strides = [1, 1]} : vector<8x32xf32> to vector<8x8xf32>
    %32 = vector.extract_strided_slice %3 {offsets = [0, 8], sizes = [8, 8], strides = [1, 1]} : vector<8x32xf32> to vector<8x8xf32>
    %33 = vector.extract_strided_slice %5 {offsets = [0, 8], sizes = [8, 8], strides = [1, 1]} : vector<8x32xf32> to vector<8x8xf32>
    %cst_17 = arith.constant dense<0.000000e+00> : vector<8x8xf32>
    %34 = tpu.matmul %31, %32, %cst_17 {dimension_numbers = #tpu.dot_dimension_numbers<[1], [1], [0], [0], [0, 0, 1, 0], [], []>} : vector<8x8xf32>, vector<8x8xf32>, vector<8x8xf32> -> vector<8x8xf32>
    %cst_18 = arith.constant 0.353553385 : f32
    %35 = vector.broadcast %cst_18 : f32 to vector<8x8xf32>
    %36 = arith.mulf %34, %35 : vector<8x8xf32>
    %cst_19 = arith.constant -1.000000e+09 : f32
    %37 = vector.shape_cast %9 : vector<1x8xi1> to vector<1x8xi1>
    %38 = vector.broadcast %37 : vector<1x8xi1> to vector<8x8xi1>
    %39 = vector.broadcast %cst_19 : f32 to vector<8x8xf32>
    %40 = arith.select %38, %36, %39 : vector<8x8xi1>, vector<8x8xf32>
    %cst_20 = arith.constant dense<0xFF800000> : vector<8xf32>
    %41 = vector.multi_reduction <maximumf>, %40, %cst_20 [1] : vector<8x8xf32> to vector<8xf32>
    %42 = vector.shape_cast %41 : vector<8xf32> to vector<8x1xf32>
    %43 = vector.broadcast %42 : vector<8x1xf32> to vector<8x8xf32>
    %44 = arith.subf %40, %43 : vector<8x8xf32>
    %45 = math.exp %44 : vector<8x8xf32>
    %cst_21 = arith.constant dense<0.000000e+00> : vector<8xf32>
    %46 = vector.multi_reduction <add>, %45, %cst_21 [1] : vector<8x8xf32> to vector<8xf32>
    %47 = vector.shape_cast %46 : vector<8xf32> to vector<8x1xf32>
    %48 = tpu.reciprocal %47 {approx = true} : vector<8x1xf32> -> vector<8x1xf32>
    %49 = vector.broadcast %48 : vector<8x1xf32> to vector<8x8xf32>
    %50 = arith.mulf %45, %49 : vector<8x8xf32>
    %cst_22 = arith.constant dense<0.000000e+00> : vector<8x8xf32>
    %51 = tpu.matmul %50, %33, %cst_22 {dimension_numbers = #tpu.dot_dimension_numbers<[1], [0], [0], [1], [0, 0, 1, 1], [], []>} : vector<8x8xf32>, vector<8x8xf32>, vector<8x8xf32> -> vector<8x8xf32>
    %52 = vector.extract_strided_slice %1 {offsets = [0, 16], sizes = [8, 8], strides = [1, 1]} : vector<8x32xf32> to vector<8x8xf32>
    %53 = vector.extract_strided_slice %3 {offsets = [0, 16], sizes = [8, 8], strides = [1, 1]} : vector<8x32xf32> to vector<8x8xf32>
    %54 = vector.extract_strided_slice %5 {offsets = [0, 16], sizes = [8, 8], strides = [1, 1]} : vector<8x32xf32> to vector<8x8xf32>
    %cst_23 = arith.constant dense<0.000000e+00> : vector<8x8xf32>
    %55 = tpu.matmul %52, %53, %cst_23 {dimension_numbers = #tpu.dot_dimension_numbers<[1], [1], [0], [0], [0, 0, 1, 0], [], []>} : vector<8x8xf32>, vector<8x8xf32>, vector<8x8xf32> -> vector<8x8xf32>
    %cst_24 = arith.constant 0.353553385 : f32
    %56 = vector.broadcast %cst_24 : f32 to vector<8x8xf32>
    %57 = arith.mulf %55, %56 : vector<8x8xf32>
    %cst_25 = arith.constant -1.000000e+09 : f32
    %58 = vector.shape_cast %9 : vector<1x8xi1> to vector<1x8xi1>
    %59 = vector.broadcast %58 : vector<1x8xi1> to vector<8x8xi1>
    %60 = vector.broadcast %cst_25 : f32 to vector<8x8xf32>
    %61 = arith.select %59, %57, %60 : vector<8x8xi1>, vector<8x8xf32>
    %cst_26 = arith.constant dense<0xFF800000> : vector<8xf32>
    %62 = vector.multi_reduction <maximumf>, %61, %cst_26 [1] : vector<8x8xf32> to vector<8xf32>
    %63 = vector.shape_cast %62 : vector<8xf32> to vector<8x1xf32>
    %64 = vector.broadcast %63 : vector<8x1xf32> to vector<8x8xf32>
    %65 = arith.subf %61, %64 : vector<8x8xf32>
    %66 = math.exp %65 : vector<8x8xf32>
    %cst_27 = arith.constant dense<0.000000e+00> : vector<8xf32>
    %67 = vector.multi_reduction <add>, %66, %cst_27 [1] : vector<8x8xf32> to vector<8xf32>
    %68 = vector.shape_cast %67 : vector<8xf32> to vector<8x1xf32>
    %69 = tpu.reciprocal %68 {approx = true} : vector<8x1xf32> -> vector<8x1xf32>
    %70 = vector.broadcast %69 : vector<8x1xf32> to vector<8x8xf32>
    %71 = arith.mulf %66, %70 : vector<8x8xf32>
    %cst_28 = arith.constant dense<0.000000e+00> : vector<8x8xf32>
    %72 = tpu.matmul %71, %54, %cst_28 {dimension_numbers = #tpu.dot_dimension_numbers<[1], [0], [0], [1], [0, 0, 1, 1], [], []>} : vector<8x8xf32>, vector<8x8xf32>, vector<8x8xf32> -> vector<8x8xf32>
    %73 = vector.extract_strided_slice %1 {offsets = [0, 24], sizes = [8, 8], strides = [1, 1]} : vector<8x32xf32> to vector<8x8xf32>
    %74 = vector.extract_strided_slice %3 {offsets = [0, 24], sizes = [8, 8], strides = [1, 1]} : vector<8x32xf32> to vector<8x8xf32>
    %75 = vector.extract_strided_slice %5 {offsets = [0, 24], sizes = [8, 8], strides = [1, 1]} : vector<8x32xf32> to vector<8x8xf32>
    %cst_29 = arith.constant dense<0.000000e+00> : vector<8x8xf32>
    %76 = tpu.matmul %73, %74, %cst_29 {dimension_numbers = #tpu.dot_dimension_numbers<[1], [1], [0], [0], [0, 0, 1, 0], [], []>} : vector<8x8xf32>, vector<8x8xf32>, vector<8x8xf32> -> vector<8x8xf32>
    %cst_30 = arith.constant 0.353553385 : f32
    %77 = vector.broadcast %cst_30 : f32 to vector<8x8xf32>
    %78 = arith.mulf %76, %77 : vector<8x8xf32>
    %cst_31 = arith.constant -1.000000e+09 : f32
    %79 = vector.shape_cast %9 : vector<1x8xi1> to vector<1x8xi1>
    %80 = vector.broadcast %79 : vector<1x8xi1> to vector<8x8xi1>
    %81 = vector.broadcast %cst_31 : f32 to vector<8x8xf32>
    %82 = arith.select %80, %78, %81 : vector<8x8xi1>, vector<8x8xf32>
    %cst_32 = arith.constant dense<0xFF800000> : vector<8xf32>
    %83 = vector.multi_reduction <maximumf>, %82, %cst_32 [1] : vector<8x8xf32> to vector<8xf32>
    %84 = vector.shape_cast %83 : vector<8xf32> to vector<8x1xf32>
    %85 = vector.broadcast %84 : vector<8x1xf32> to vector<8x8xf32>
    %86 = arith.subf %82, %85 : vector<8x8xf32>
    %87 = math.exp %86 : vector<8x8xf32>
    %cst_33 = arith.constant dense<0.000000e+00> : vector<8xf32>
    %88 = vector.multi_reduction <add>, %87, %cst_33 [1] : vector<8x8xf32> to vector<8xf32>
    %89 = vector.shape_cast %88 : vector<8xf32> to vector<8x1xf32>
    %90 = tpu.reciprocal %89 {approx = true} : vector<8x1xf32> -> vector<8x1xf32>
    %91 = vector.broadcast %90 : vector<8x1xf32> to vector<8x8xf32>
    %92 = arith.mulf %87, %91 : vector<8x8xf32>
    %cst_34 = arith.constant dense<0.000000e+00> : vector<8x8xf32>
    %93 = tpu.matmul %92, %75, %cst_34 {dimension_numbers = #tpu.dot_dimension_numbers<[1], [0], [0], [1], [0, 0, 1, 1], [], []>} : vector<8x8xf32>, vector<8x8xf32>, vector<8x8xf32> -> vector<8x8xf32>
    %94 = tpu.concatenate %30, %51, %72, %93 in 1 : vector<8x8xf32>, vector<8x8xf32>, vector<8x8xf32>, vector<8x8xf32> -> vector<8x32xf32>
    %c0_35 = arith.constant 0 : index
    %c0_36 = arith.constant 0 : index
    %c0_37 = arith.constant 0 : index
    %95 = vector.load %arg5[%c0_35, %c0_36, %c0_37] : memref<1x8x32xf32, #tpu.memory_space<vmem>>, vector<1x8x32xf32>
    %96 = vector.shape_cast %95 : vector<1x8x32xf32> to vector<8x32xf32>
    %97 = vector.shape_cast %94 : vector<8x32xf32> to vector<1x8x32xf32>
    tpu.vector_store %arg5[%c0_35, %c0_36, %c0_37], %97 {strides = array<i32>} : memref<1x8x32xf32, #tpu.memory_space<vmem>>, vector<1x8x32xf32>,
    return
  }
  func.func @transform_0(%arg0: i32) -> (i32, i32, i32) {
    %c0_i32 = arith.constant 0 : i32
    %c0_i32_0 = arith.constant 0 : i32
    %c0_i32_1 = arith.constant 0 : i32
    return %arg0, %c0_i32, %c0_i32_0 : i32, i32, i32
  }
  func.func @transform_1(%arg0: i32) -> (i32, i32, i32) {
    %c0_i32 = arith.constant 0 : i32
    %c0_i32_0 = arith.constant 0 : i32
    %c0_i32_1 = arith.constant 0 : i32
    return %arg0, %c0_i32, %c0_i32_0 : i32, i32, i32
  }
  func.func @transform_2(%arg0: i32) -> (i32, i32, i32) {
    %c0_i32 = arith.constant 0 : i32
    %c0_i32_0 = arith.constant 0 : i32
    %c0_i32_1 = arith.constant 0 : i32
    return %arg0, %c0_i32, %c0_i32_0 : i32, i32, i32
  }
  func.func @transform_3(%arg0: i32) -> (i32, i32, i32) {
    %c0_i32 = arith.constant 0 : i32
    %c0_i32_0 = arith.constant 0 : i32
    %c0_i32_1 = arith.constant 0 : i32
    return %arg0, %c0_i32, %c0_i32_0 : i32, i32, i32
  }
  func.func @transform_4(%arg0: i32) -> (i32, i32, i32) {
    %c0_i32 = arith.constant 0 : i32
    %c0_i32_0 = arith.constant 0 : i32
    %c0_i32_1 = arith.constant 0 : i32
    return %arg0, %c0_i32, %c0_i32_0 : i32, i32, i32
  }
}

module attributes {stable_mosaic.version = 11 : i64} {
  func.func @_ffn_add_ln_kernel(%arg0: i32, %arg1: memref<16x32xf32, #tpu.memory_space<vmem>>, %arg2: memref<32x64xf32, #tpu.memory_space<vmem>>, %arg3: memref<1x64xf32, #tpu.memory_space<vmem>>, %arg4: memref<64x32xf32, #tpu.memory_space<vmem>>, %arg5: memref<1x32xf32, #tpu.memory_space<vmem>>, %arg6: memref<1x32xf32, #tpu.memory_space<vmem>>, %arg7: memref<1x32xf32, #tpu.memory_space<vmem>>, %arg8: memref<16x32xf32, #tpu.memory_space<vmem>>) attributes {dimension_semantics = [#tpu.dimension_semantics<parallel>], iteration_bounds = array<i64: 1>, scalar_prefetch = 0 : i64, scratch_operands = 0 : i64, tpu.core_type = #tpu.core_type<tc>, window_params = [{transform_indices = @transform_0, window_bounds = array<i64: 16, 32>}, {pipeline_mode = #tpu.pipeline_mode<synchronous>, transform_indices = @transform_1, window_bounds = array<i64: 32, 64>}, {pipeline_mode = #tpu.pipeline_mode<synchronous>, transform_indices = @transform_2, window_bounds = array<i64: 1, 64>}, {pipeline_mode = #tpu.pipeline_mode<synchronous>, transform_indices = @transform_3, window_bounds = array<i64: 64, 32>}, {pipeline_mode = #tpu.pipeline_mode<synchronous>, transform_indices = @transform_4, window_bounds = array<i64: 1, 32>}, {pipeline_mode = #tpu.pipeline_mode<synchronous>, transform_indices = @transform_5, window_bounds = array<i64: 1, 32>}, {pipeline_mode = #tpu.pipeline_mode<synchronous>, transform_indices = @transform_6, window_bounds = array<i64: 1, 32>}, {transform_indices = @transform_7, window_bounds = array<i64: 16, 32>}]} {
    %c0 = arith.constant 0 : index
    %c0_0 = arith.constant 0 : index
    %0 = vector.load %arg1[%c0, %c0_0] : memref<16x32xf32, #tpu.memory_space<vmem>>, vector<16x32xf32>
    %c0_1 = arith.constant 0 : index
    %c0_2 = arith.constant 0 : index
    %1 = vector.load %arg2[%c0_1, %c0_2] : memref<32x64xf32, #tpu.memory_space<vmem>>, vector<32x64xf32>
    %cst = arith.constant dense<0.000000e+00> : vector<16x64xf32>
    %2 = tpu.matmul %0, %1, %cst {dimension_numbers = #tpu.dot_dimension_numbers<[1], [0], [0], [1], [0, 0, 1, 1], [], []>} : vector<16x32xf32>, vector<32x64xf32>, vector<16x64xf32> -> vector<16x64xf32>
    %c0_3 = arith.constant 0 : index
    %c0_4 = arith.constant 0 : index
    %3 = vector.load %arg3[%c0_3, %c0_4] : memref<1x64xf32, #tpu.memory_space<vmem>>, vector<1x64xf32>
    %4 = vector.broadcast %3 : vector<1x64xf32> to vector<16x64xf32>
    %5 = arith.addf %2, %4 : vector<16x64xf32>
    %cst_5 = arith.constant 0.000000e+00 : f32
    %6 = vector.broadcast %cst_5 : f32 to vector<16x64xf32>
    %7 = arith.maximumf %5, %6 : vector<16x64xf32>
    %c0_6 = arith.constant 0 : index
    %c0_7 = arith.constant 0 : index
    %8 = vector.load %arg4[%c0_6, %c0_7] : memref<64x32xf32, #tpu.memory_space<vmem>>, vector<64x32xf32>
    %cst_8 = arith.constant dense<0.000000e+00> : vector<16x32xf32>
    %9 = tpu.matmul %7, %8, %cst_8 {dimension_numbers = #tpu.dot_dimension_numbers<[1], [0], [0], [1], [0, 0, 1, 1], [], []>} : vector<16x64xf32>, vector<64x32xf32>, vector<16x32xf32> -> vector<16x32xf32>
    %c0_9 = arith.constant 0 : index
    %c0_10 = arith.constant 0 : index
    %10 = vector.load %arg5[%c0_9, %c0_10] : memref<1x32xf32, #tpu.memory_space<vmem>>, vector<1x32xf32>
    %11 = vector.broadcast %10 : vector<1x32xf32> to vector<16x32xf32>
    %12 = arith.addf %9, %11 : vector<16x32xf32>
    %13 = arith.addf %12, %0 : vector<16x32xf32>
    %c0_11 = arith.constant 0 : index
    %c0_12 = arith.constant 0 : index
    %14 = vector.load %arg6[%c0_11, %c0_12] : memref<1x32xf32, #tpu.memory_space<vmem>>, vector<1x32xf32>
    %c0_13 = arith.constant 0 : index
    %c0_14 = arith.constant 0 : index
    %15 = vector.load %arg7[%c0_13, %c0_14] : memref<1x32xf32, #tpu.memory_space<vmem>>, vector<1x32xf32>
    %cst_15 = arith.constant dense<0.000000e+00> : vector<16xf32>
    %16 = vector.multi_reduction <add>, %13, %cst_15 [1] : vector<16x32xf32> to vector<16xf32>
    %17 = vector.shape_cast %16 : vector<16xf32> to vector<16x1xf32>
    %cst_16 = arith.constant 3.200000e+01 : f32
    %18 = vector.broadcast %cst_16 : f32 to vector<16x1xf32>
    %19 = arith.divf %17, %18 : vector<16x1xf32>
    %20 = vector.broadcast %19 : vector<16x1xf32> to vector<16x32xf32>
    %21 = arith.subf %13, %20 : vector<16x32xf32>
    %22 = arith.mulf %21, %21 : vector<16x32xf32>
    %cst_17 = arith.constant dense<0.000000e+00> : vector<16xf32>
    %23 = vector.multi_reduction <add>, %22, %cst_17 [1] : vector<16x32xf32> to vector<16xf32>
    %24 = vector.shape_cast %23 : vector<16xf32> to vector<16x1xf32>
    %cst_18 = arith.constant 3.200000e+01 : f32
    %25 = vector.broadcast %cst_18 : f32 to vector<16x1xf32>
    %26 = arith.divf %24, %25 : vector<16x1xf32>
    %27 = vector.broadcast %19 : vector<16x1xf32> to vector<16x32xf32>
    %28 = arith.subf %13, %27 : vector<16x32xf32>
    %cst_19 = arith.constant 9.99999974E-6 : f32
    %29 = vector.broadcast %cst_19 : f32 to vector<16x1xf32>
    %30 = arith.addf %26, %29 : vector<16x1xf32>
    %31 = math.rsqrt %30 : vector<16x1xf32>
    %32 = vector.broadcast %31 : vector<16x1xf32> to vector<16x32xf32>
    %33 = arith.mulf %28, %32 : vector<16x32xf32>
    %34 = vector.broadcast %14 : vector<1x32xf32> to vector<16x32xf32>
    %35 = arith.mulf %33, %34 : vector<16x32xf32>
    %36 = vector.broadcast %15 : vector<1x32xf32> to vector<16x32xf32>
    %37 = arith.addf %35, %36 : vector<16x32xf32>
    %c0_20 = arith.constant 0 : index
    %c0_21 = arith.constant 0 : index
    %38 = vector.load %arg8[%c0_20, %c0_21] : memref<16x32xf32, #tpu.memory_space<vmem>>, vector<16x32xf32>
    tpu.vector_store %arg8[%c0_20, %c0_21], %37 {strides = array<i32>} : memref<16x32xf32, #tpu.memory_space<vmem>>, vector<16x32xf32>,
    return
  }
  func.func @transform_0(%arg0: i32) -> (i32, i32) {
    %c0_i32 = arith.constant 0 : i32
    %c0_i32_0 = arith.constant 0 : i32
    return %arg0, %c0_i32 : i32, i32
  }
  func.func @transform_1(%arg0: i32) -> (i32, i32) {
    %c0_i32 = arith.constant 0 : i32
    %c0_i32_0 = arith.constant 0 : i32
    %c0_i32_1 = arith.constant 0 : i32
    return %c0_i32, %c0_i32_0 : i32, i32
  }
  func.func @transform_2(%arg0: i32) -> (i32, i32) {
    %c0_i32 = arith.constant 0 : i32
    %c0_i32_0 = arith.constant 0 : i32
    %c0_i32_1 = arith.constant 0 : i32
    return %c0_i32, %c0_i32_0 : i32, i32
  }
  func.func @transform_3(%arg0: i32) -> (i32, i32) {
    %c0_i32 = arith.constant 0 : i32
    %c0_i32_0 = arith.constant 0 : i32
    %c0_i32_1 = arith.constant 0 : i32
    return %c0_i32, %c0_i32_0 : i32, i32
  }
  func.func @transform_4(%arg0: i32) -> (i32, i32) {
    %c0_i32 = arith.constant 0 : i32
    %c0_i32_0 = arith.constant 0 : i32
    %c0_i32_1 = arith.constant 0 : i32
    return %c0_i32, %c0_i32_0 : i32, i32
  }
  func.func @transform_5(%arg0: i32) -> (i32, i32) {
    %c0_i32 = arith.constant 0 : i32
    %c0_i32_0 = arith.constant 0 : i32
    %c0_i32_1 = arith.constant 0 : i32
    return %c0_i32, %c0_i32_0 : i32, i32
  }
  func.func @transform_6(%arg0: i32) -> (i32, i32) {
    %c0_i32 = arith.constant 0 : i32
    %c0_i32_0 = arith.constant 0 : i32
    %c0_i32_1 = arith.constant 0 : i32
    return %c0_i32, %c0_i32_0 : i32, i32
  }
  func.func @transform_7(%arg0: i32) -> (i32, i32) {
    %c0_i32 = arith.constant 0 : i32
    %c0_i32_0 = arith.constant 0 : i32
    return %arg0, %c0_i32 : i32, i32
  }
}

module attributes {stable_mosaic.version = 11 : i64} {
  func.func @_matmul_bias_kernel(%arg0: i32, %arg1: i32, %arg2: memref<16x32xf32, #tpu.memory_space<vmem>>, %arg3: memref<32x64xf32, #tpu.memory_space<vmem>>, %arg4: memref<1x64xf32, #tpu.memory_space<vmem>>, %arg5: memref<16x64xf32, #tpu.memory_space<vmem>>) attributes {dimension_semantics = [#tpu.dimension_semantics<parallel>, #tpu.dimension_semantics<parallel>], iteration_bounds = array<i64: 1, 1>, scalar_prefetch = 0 : i64, scratch_operands = 0 : i64, tpu.core_type = #tpu.core_type<tc>, window_params = [{transform_indices = @transform_0, window_bounds = array<i64: 16, 32>}, {transform_indices = @transform_1, window_bounds = array<i64: 32, 64>}, {transform_indices = @transform_2, window_bounds = array<i64: 1, 64>}, {transform_indices = @transform_3, window_bounds = array<i64: 16, 64>}]} {
    %c0 = arith.constant 0 : index
    %c0_0 = arith.constant 0 : index
    %0 = vector.load %arg2[%c0, %c0_0] : memref<16x32xf32, #tpu.memory_space<vmem>>, vector<16x32xf32>
    %c0_1 = arith.constant 0 : index
    %c0_2 = arith.constant 0 : index
    %1 = vector.load %arg3[%c0_1, %c0_2] : memref<32x64xf32, #tpu.memory_space<vmem>>, vector<32x64xf32>
    %cst = arith.constant dense<0.000000e+00> : vector<16x64xf32>
    %2 = tpu.matmul %0, %1, %cst {dimension_numbers = #tpu.dot_dimension_numbers<[1], [0], [0], [1], [0, 0, 1, 1], [], []>} : vector<16x32xf32>, vector<32x64xf32>, vector<16x64xf32> -> vector<16x64xf32>
    %c0_3 = arith.constant 0 : index
    %c0_4 = arith.constant 0 : index
    %3 = vector.load %arg4[%c0_3, %c0_4] : memref<1x64xf32, #tpu.memory_space<vmem>>, vector<1x64xf32>
    %4 = vector.broadcast %3 : vector<1x64xf32> to vector<16x64xf32>
    %5 = arith.addf %2, %4 : vector<16x64xf32>
    %c0_5 = arith.constant 0 : index
    %c0_6 = arith.constant 0 : index
    %6 = vector.load %arg5[%c0_5, %c0_6] : memref<16x64xf32, #tpu.memory_space<vmem>>, vector<16x64xf32>
    tpu.vector_store %arg5[%c0_5, %c0_6], %5 {strides = array<i32>} : memref<16x64xf32, #tpu.memory_space<vmem>>, vector<16x64xf32>,
    return
  }
  func.func @transform_0(%arg0: i32, %arg1: i32) -> (i32, i32) {
    %c0_i32 = arith.constant 0 : i32
    %c0_i32_0 = arith.constant 0 : i32
    return %arg0, %c0_i32 : i32, i32
  }
  func.func @transform_1(%arg0: i32, %arg1: i32) -> (i32, i32) {
    %c0_i32 = arith.constant 0 : i32
    %c0_i32_0 = arith.constant 0 : i32
    return %c0_i32, %arg1 : i32, i32
  }
  func.func @transform_2(%arg0: i32, %arg1: i32) -> (i32, i32) {
    %c0_i32 = arith.constant 0 : i32
    %c0_i32_0 = arith.constant 0 : i32
    return %c0_i32, %arg1 : i32, i32
  }
  func.func @transform_3(%arg0: i32, %arg1: i32) -> (i32, i32) {
    %c0_i32 = arith.constant 0 : i32
    return %arg0, %arg1 : i32, i32
  }
}

module attributes {stable_mosaic.version = 11 : i64} {
  func.func @_matmul_bias_kernel(%arg0: i32, %arg1: i32, %arg2: memref<16x32xf32, #tpu.memory_space<vmem>>, %arg3: memref<32x32xf32, #tpu.memory_space<vmem>>, %arg4: memref<1x32xf32, #tpu.memory_space<vmem>>, %arg5: memref<16x32xf32, #tpu.memory_space<vmem>>) attributes {dimension_semantics = [#tpu.dimension_semantics<parallel>, #tpu.dimension_semantics<parallel>], iteration_bounds = array<i64: 1, 1>, scalar_prefetch = 0 : i64, scratch_operands = 0 : i64, tpu.core_type = #tpu.core_type<tc>, window_params = [{transform_indices = @transform_0, window_bounds = array<i64: 16, 32>}, {transform_indices = @transform_1, window_bounds = array<i64: 32, 32>}, {transform_indices = @transform_2, window_bounds = array<i64: 1, 32>}, {transform_indices = @transform_3, window_bounds = array<i64: 16, 32>}]} {
    %c0 = arith.constant 0 : index
    %c0_0 = arith.constant 0 : index
    %0 = vector.load %arg2[%c0, %c0_0] : memref<16x32xf32, #tpu.memory_space<vmem>>, vector<16x32xf32>
    %c0_1 = arith.constant 0 : index
    %c0_2 = arith.constant 0 : index
    %1 = vector.load %arg3[%c0_1, %c0_2] : memref<32x32xf32, #tpu.memory_space<vmem>>, vector<32x32xf32>
    %cst = arith.constant dense<0.000000e+00> : vector<16x32xf32>
    %2 = tpu.matmul %0, %1, %cst {dimension_numbers = #tpu.dot_dimension_numbers<[1], [0], [0], [1], [0, 0, 1, 1], [], []>} : vector<16x32xf32>, vector<32x32xf32>, vector<16x32xf32> -> vector<16x32xf32>
    %c0_3 = arith.constant 0 : index
    %c0_4 = arith.constant 0 : index
    %3 = vector.load %arg4[%c0_3, %c0_4] : memref<1x32xf32, #tpu.memory_space<vmem>>, vector<1x32xf32>
    %4 = vector.broadcast %3 : vector<1x32xf32> to vector<16x32xf32>
    %5 = arith.addf %2, %4 : vector<16x32xf32>
    %c0_5 = arith.constant 0 : index
    %c0_6 = arith.constant 0 : index
    %6 = vector.load %arg5[%c0_5, %c0_6] : memref<16x32xf32, #tpu.memory_space<vmem>>, vector<16x32xf32>
    tpu.vector_store %arg5[%c0_5, %c0_6], %5 {strides = array<i32>} : memref<16x32xf32, #tpu.memory_space<vmem>>, vector<16x32xf32>,
    return
  }
  func.func @transform_0(%arg0: i32, %arg1: i32) -> (i32, i32) {
    %c0_i32 = arith.constant 0 : i32
    %c0_i32_0 = arith.constant 0 : i32
    return %arg0, %c0_i32 : i32, i32
  }
  func.func @transform_1(%arg0: i32, %arg1: i32) -> (i32, i32) {
    %c0_i32 = arith.constant 0 : i32
    %c0_i32_0 = arith.constant 0 : i32
    return %c0_i32, %arg1 : i32, i32
  }
  func.func @transform_2(%arg0: i32, %arg1: i32) -> (i32, i32) {
    %c0_i32 = arith.constant 0 : i32
    %c0_i32_0 = arith.constant 0 : i32
    return %c0_i32, %arg1 : i32, i32
  }
  func.func @transform_3(%arg0: i32, %arg1: i32) -> (i32, i32) {
    %c0_i32 = arith.constant 0 : i32
    return %arg0, %arg1 : i32, i32
  }
}

</mosaic_0001>

<bundles_post_ra>
// kernel: transformer_forward.37
= control target key start
LH: loop header
LB: loop body
LE: loop exit
PB: predicated region body
PF: predicated region fallthrough
CT: control target
= control target key end

     0   :  { %vm27_vm0 = vcmask 261120   ;;  %vm109_vm1 = vcmask 785408   ;;  %s191_s1 = inlined_call_operand.vmem [shape: f32[32,96], index: 1, kind: input, shape index: {}]   ;;  %s192_s0 = inlined_call_operand.vmem [shape: f32[16,32], index: 0, kind: input, shape index: {}]   ;;  %s193_s2 = inlined_call_operand.vmem [shape: f32[1,96], index: 2, kind: input, shape index: {}]   ;;  %s194_s3 = inlined_call_operand.vmem [shape: f32[16,96], index: 3, kind: output, shape index: {}]  }
   0x1   :  { %v16_v0 = vld [vmem:[%s191_s1] sm:$0xff]  ;;  %v17_v1 = vld [vmem:[%s191_s1 + $0x8] sm:$0xff]  ;;  %v18_v2 = vld [vmem:[%s191_s1 + $0x10] sm:$0xff] }
   0x2   :  { %v136_v3 = vpack.c.bf16 %v17_v1, %v16_v0  ;;  %v19_v4 = vld [vmem:[%s191_s1 + $0x18] sm:$0xff]  ;;  %v14_v5 = vld [vmem:[%s192_s0] sm:$0xff]  ;;  %v15_v7 = vld [vmem:[%s192_s0 + $0x8] sm:$0xff] }
   0x3   :  { %v140_v6 = vpack.c.bf16 %v19_v4, %v18_v2  ;;  %133 = vmatprep.mubr.msk.f32.mxu0 %vm27_vm0, %v14_v5  ;;  %v116_v8 = vld [vmem:[%s193_s2] ss:$0 sm:$0xff] }
   0x4   :  { %137 = vmatprep.subr.bf16.mxu0 %v136_v3 }
   0x5   :  { %139 = vmatpush3.bf16.msra.mxu0 %v136_v3 }
   0x6   :  { %141 = vmatprep.subr.bf16.mxu0 %v140_v6 }
   0x9   :  { %143 = vmatpush3.bf16.msra.mxu0 %v140_v6 }
   0xc   :  { %134 = vmatmul.mubr.msk.f32.vlgmr.msra.gmra.mrb[0].mxu0 %vm27_vm0, %v15_v7 }
  0xdf   :  { %v135_v9 = vpop.f32.mrb[0].mxu0 }
  0xe0   :  { %v106_v10 = vadd.f32 %v135_v9, %v116_v8  ;;  %v100_v11 = vpop.f32.mrb[1].mxu0 }
  0xe1   :  { %v101_v12 = vadd.f32 %v116_v8, %v100_v11 }
  0xe2   :  { %111 = vst.msk [vmem:[%s194_s3 + $0x8] sm:$0xff] %vm109_vm1, %v106_v10 }
  0xe3   :  { %110 = vst.msk [vmem:[%s194_s3] sm:$0xff] %vm109_vm1, %v101_v12 }

// kernel: transformer_forward.27
= control target key start
LH: loop header
LB: loop body
LE: loop exit
PB: predicated region body
PF: predicated region fallthrough
CT: control target
= control target key end

     0   :  { %vm29_vm0 = vcmask 392192   ;;  %vm111_vm1 = vcmask 261120   ;;  %s211_s1 = inlined_call_operand.vmem [shape: f32[48,32], index: 1, kind: input, shape index: {}]   ;;  %s212_s0 = inlined_call_operand.vmem [shape: f32[16,48], index: 0, kind: input, shape index: {}]   ;;  %s213_s2 = inlined_call_operand.vmem [shape: f32[1,32], index: 2, kind: input, shape index: {}]   ;;  %s214_s3 = inlined_call_operand.vmem [shape: f32[16,32], index: 3, kind: output, shape index: {}]  }
   0x1   :  { %v16_v0 = vld [vmem:[%s211_s1] sm:$0xff]  ;;  %v17_v1 = vld [vmem:[%s211_s1 + $0x8] sm:$0xff]  ;;  %v18_v2 = vld [vmem:[%s211_s1 + $0x10] sm:$0xff] }
   0x2   :  { %v144_v3 = vpack.c.bf16 %v17_v1, %v16_v0  ;;  %v19_v4 = vld [vmem:[%s211_s1 + $0x18] sm:$0xff]  ;;  %v20_v6 = vld [vmem:[%s211_s1 + $0x20] sm:$0xff]  ;;  %v21_v7 = vld [vmem:[%s211_s1 + $0x28] sm:$0xff] }
   0x3   :  { %v148_v5 = vpack.c.bf16 %v19_v4, %v18_v2  ;;  %v14_v8 = vld [vmem:[%s212_s0] sm:$0xff]  ;;  %v152_v9 = vpack.c.bf16 %v21_v7, %v20_v6  ;;  %v15_v10 = vld [vmem:[%s212_s0 + $0x8] sm:$0xff] }
   0x4   :  { %145 = vmatprep.subr.bf16.mxu0 %v144_v3  ;;  %141 = vmatprep.mubr.msk.f32.mxu0 %vm29_vm0, %v14_v8  ;;  %v118_v11 = vld [vmem:[%s213_s2] ss:$0 sm:$0xff] }
   0x5   :  { %147 = vmatpush3.bf16.msra.mxu0 %v144_v3 }
   0x6   :  { %149 = vmatprep.subr.bf16.mxu0 %v148_v5 }
   0x9   :  { %151 = vmatpush3.bf16.msra.mxu0 %v148_v5 }
   0xa   :  { %153 = vmatprep.subr.bf16.mxu0 %v152_v9 }
   0xd   :  { %155 = vmatpush3.bf16.msra.mxu0 %v152_v9 }
  0x10   :  { %142 = vmatmul.mubr.msk.f32.vlgmr.msra.gmra.mrb[0].mxu0 %vm29_vm0, %v15_v10 }
  0xe3   :  { %v143_v12 = vpop.f32.mrb[0].mxu0 }
  0xe4   :  { %v108_v13 = vadd.f32 %v143_v12, %v118_v11  ;;  %v102_v14 = vpop.f32.mrb[1].mxu0 }
  0xe5   :  { %v103_v15 = vadd.f32 %v118_v11, %v102_v14 }
  0xe6   :  { %113 = vst.msk [vmem:[%s214_s3 + $0x8] sm:$0xff] %vm111_vm1, %v108_v13 }
  0xe7   :  { %112 = vst.msk [vmem:[%s214_s3] sm:$0xff] %vm111_vm1, %v103_v15 }

// kernel: transformer_forward.39
= control target key start
LH: loop header
LB: loop body
LE: loop exit
PB: predicated region body
PF: predicated region fallthrough
CT: control target
= control target key end

     0   :  { %vm36_vm0 = vcmask 261120   ;;  %s289_s1 = inlined_call_operand.vmem [shape: f32[32,32], index: 1, kind: input, shape index: {}]   ;;  %s290_s0 = inlined_call_operand.vmem [shape: f32[16,32], index: 0, kind: input, shape index: {}]   ;;  %s291_s2 = inlined_call_operand.vmem [shape: f32[1,32], index: 2, kind: input, shape index: {}]   ;;  %s292_s3 = inlined_call_operand.vmem [shape: f32[16,32], index: 3, kind: input, shape index: {}]   ;;  %s293_s4 = inlined_call_operand.vmem [shape: f32[1,32], index: 4, kind: input, shape index: {}]   ;;  %s294_s5 = inlined_call_operand.vmem [shape: f32[1,32], index: 5, kind: input, shape index: {}]   ;;  %s295_s6 = inlined_call_operand.vmem [shape: f32[16,32], index: 6, kind: output, shape index: {}]  }
   0x1   :  { %v25_v0 = vld [vmem:[%s289_s1] sm:$0xff]  ;;  %v26_v1 = vld [vmem:[%s289_s1 + $0x8] sm:$0xff]  ;;  %v27_v2 = vld [vmem:[%s289_s1 + $0x10] sm:$0xff] }
   0x2   :  { %v195_v3 = vpack.c.bf16 %v26_v1, %v25_v0  ;;  %v28_v4 = vld [vmem:[%s289_s1 + $0x18] sm:$0xff]  ;;  %v23_v5 = vld [vmem:[%s290_s0] sm:$0xff]  ;;  %v24_v7 = vld [vmem:[%s290_s0 + $0x8] sm:$0xff] }
   0x3   :  { %v199_v6 = vpack.c.bf16 %v28_v4, %v27_v2  ;;  %192 = vmatprep.mubr.msk.f32.mxu0 %vm36_vm0, %v23_v5  ;;  %v173_v8 = vld [vmem:[%s291_s2] ss:$0 sm:$0xff]  ;;  %v119_v14 = vld [vmem:[%s292_s3 + $0x8] sm:$0xff] }
   0x4   :  { %196 = vmatprep.subr.bf16.mxu0 %v195_v3  ;;  %v118_v11 = vld [vmem:[%s292_s3] sm:$0xff] }
   0x5   :  { %198 = vmatpush3.bf16.msra.mxu0 %v195_v3  ;;  %v176_v36 = vld [vmem:[%s293_s4] ss:$0 sm:$0xff] }
   0x6   :  { %200 = vmatprep.subr.bf16.mxu0 %v199_v6  ;;  %v177_v38 = vld [vmem:[%s294_s5] ss:$0 sm:$0xff] }
   0x9   :  { %202 = vmatpush3.bf16.msra.mxu0 %v199_v6 }
   0xc   :  { %193 = vmatmul.mubr.msk.f32.vlgmr.msra.gmra.mrb[0].mxu0 %vm36_vm0, %v24_v7 }
  0xdf   :  { %v194_v9 = vpop.f32.mrb[0].mxu0 }
  0xe0   :  { %v109_v10 = vpop.f32.mrb[1].mxu0  ;;  %v115_v12 = vadd.f32 %v194_v9, %v173_v8 }
  0xe1   :  { %v110_v13 = vadd.f32 %v173_v8, %v109_v10 }
  0xe2   :  { %v121_v17 = vadd.f32 %v119_v14, %v115_v12 }
  0xe3   :  { %v120_v15 = vadd.f32 %v118_v11, %v110_v13 }
  0xe4   :  { %v127_v18 = vsel %vm36_vm0, %v121_v17, 0.0 }
  0xe5   :  { %v124_v16 = vsel %vm36_vm0, %v120_v15, 0.0 }
  0xe6   :  { %125 = vadd.xlane.f32.xlu0 %v124_v16 }
  0xea   :  { %128 = vadd.xlane.f32.xlu0 %v127_v18 }
 0x173   :  { %v126_v19 = vpop.xlane.xlu0 %125 }
 0x174   :  { %v131_v20 = vmul.f32 0.03125, %v126_v19 }
 0x176   :  { %v133_v21 = vsub.f32 %v120_v15, %v131_v20 }
 0x177   :  { %v129_v22 = vpop.xlane.xlu0 %128 }
 0x178   :  { %v132_v23 = vmul.f32 0.03125, %v129_v22  ;;  %v135_v24 = vmul.f32 %v133_v21, %v133_v21 }
 0x17a   :  { %v134_v25 = vsub.f32 %v121_v17, %v132_v23  ;;  %v137_v26 = vsel %vm36_vm0, %v135_v24, 0.0 }
 0x17b   :  { %138 = vadd.xlane.f32.xlu1 %v137_v26 }
 0x17c   :  { %v136_v27 = vmul.f32 %v134_v25, %v134_v25 }
 0x17e   :  { %v140_v28 = vsel %vm36_vm0, %v136_v27, 0.0 }
 0x17f   :  { %141 = vadd.xlane.f32.xlu1 %v140_v28 }
 0x208   :  { %v139_v29 = vpop.xlane.xlu1 %138 }
 0x209   :  { %v143_v30 = vmul.f32 0.03125, %v139_v29 }
 0x20b   :  { %v145_v31 = vadd.f32 1e-05, %v143_v30 }
 0x20c   :  { %v142_v32 = vpop.xlane.xlu1 %141 }
 0x20d   :  { %203 = vrsqrt.f32 %v145_v31  ;;  %v144_v33 = vmul.f32 0.03125, %v142_v32 }
 0x20f   :  { %v146_v34 = vadd.f32 1e-05, %v144_v33 }
 0x211   :  { %205 = vrsqrt.f32 %v146_v34 }
 0x217   :  { %v204_v35 = vpop.eup %203 }
 0x218   :  { %v149_v37 = vmul.f32 %v204_v35, %v133_v21 }
 0x21a   :  { %v157_v39 = vmul.f32 %v176_v36, %v149_v37 }
 0x21b   :  { %v206_v40 = vpop.eup %205 }
 0x21c   :  { %v165_v41 = vadd.f32 %v177_v38, %v157_v39  ;;  %v150_v42 = vmul.f32 %v206_v40, %v134_v25 }
 0x21e   :  { %167 = vst.msk [vmem:[%s295_s6] sm:$0xff] %vm36_vm0, %v165_v41  ;;  %v158_v43 = vmul.f32 %v176_v36, %v150_v42 }
 0x220   :  { %v166_v44 = vadd.f32 %v177_v38, %v158_v43 }
 0x222   :  { %168 = vst.msk [vmem:[%s295_s6 + $0x8] sm:$0xff] %vm36_vm0, %v166_v44 }

// kernel: transformer_forward.38
= control target key start
LH: loop header
LB: loop body
LE: loop exit
PB: predicated region body
PF: predicated region fallthrough
CT: control target
= control target key end

     0   :  { %s1175_s15 = smov 0   ;;  %s1282_s0 = inlined_call_operand.vmem [shape: f32[2,8,32], index: 0, kind: input, shape index: {}]   ;;  %s1283_s1 = inlined_call_operand.vmem [shape: f32[2,8,32], index: 1, kind: input, shape index: {}]   ;;  %s1284_s2 = inlined_call_operand.vmem [shape: f32[2,8,32], index: 2, kind: input, shape index: {}]   ;;  %s1285_s3 = inlined_call_operand.vmem [shape: f32[2,8,8], index: 3, kind: input, shape index: {}]   ;;  %s1286_s4 = inlined_call_operand.vmem [shape: f32[2,8,32], index: 4, kind: output, shape index: {}]  }
   0x1 LB: > { %s1022_s16 = sadd.s32 4294967295, %s1140_s15   ;;  %p1026_p0 = scmp.ge.s32.totalorder %s1140_s15, 1  ;;  %s1140_s15 = sphi %s1175_s15, %s14_s15  }
   0x2   : > { %p188_p1 = scmp.lt.s32.totalorder %s1140_s15, 3 }
   0x4   : > { %p189_p2 = pnand %p1026_p0, %p188_p1 }
   0x5   : > { %p224_p3 = scmp.lt.s32.totalorder (!%p189_p2), %s1022_s16, 1  ;;  %v1142_v0 = vmov (!%p189_p2), 0.0   ;;  %vm1143_vm0 = vmmov (!%p189_p2), 0   ;;  %vm249_vm1 = vcmask (!%p189_p2), 64512   ;;  %s1144_s27 = smov (!%p189_p2), 120   ;;  %vm927_vm3 = vcmask (!%p189_p2), 130048  }
   0x6   : > { %192 = sbr.rel (%p189_p2) target bundleno = 1464 (0x5b8), region = 36  ;;  %1062 = vmatprep.subr.mxu0 (!%p189_p2), %v1142_v0  ;;  %1064 = vmatprep.mubr.msk.f32.mxu0 (!%p189_p2), %vm1143_vm0, %v1142_v0  ;;  %s1145_s28 = smov (!%p189_p2), 112   ;;  %vm929_vm4 = vcmask (!%p189_p2), 195584   ;;  %vm931_vm5 = vcmask (!%p189_p2), 261120  }
   0x7   : > { %1067 = vmatprep.subr.mxu1 (!%p189_p2), %v1142_v0  ;;  %1069 = vmatprep.mubr.msk.f32.mxu1 (!%p189_p2), %vm1143_vm0, %v1142_v0  ;;  %s1146_s29 = smov (!%p189_p2), 104   ;;  %s1147_s7 = smov (!%p189_p2), 8  }
   0x8   : > { %s1148_s8 = smov (!%p189_p2), 16   ;;  %s1149_s9 = smov (!%p189_p2), 24  }
   0xd   : > { %s1288_s16 = smov (!%p224_p3, %s1022_s16), 1 }
   0xe   : > { %s1189_s17 = sshll.u32 %s1288_s16, 3 }
   0xf   : > { %s231_s20 = scalar_lea.vmem %s1283_s1, %s1189_s17  ;;  %s227_s23 = scalar_lea.vmem %s1282_s0, %s1189_s17 }
  0x10   : > { %v245_v1 = vld [vmem:[%s231_s20] sm:$0xff]  ;;  %s239_s26 = scalar_lea.vmem %s1285_s3, %s1189_s17  ;;  %s235_s6 = scalar_lea.vmem %s1284_s2, %s1189_s17 }
  0x11   : > { %1063 = vmatpush3.xpose.msk.msra.mxu0 %vm249_vm1, %v245_v1  ;;  %v244_v2 = vld [vmem:[%s227_s23] sm:$0xff]  ;;  %414 = vrot.lane.b32.xlu1 %v245_v1, %s1144_s27  ;;  %s243_s12 = scalar_lea.vmem %s1286_s4, %s1189_s17 }
  0x12   : > { %1077 = vmatprep.subr.mxu0 %v1142_v0  ;;  %v1208_v3 = vld [vmem:[%s239_s26] sm:$0xff] }
  0x13   : > { %vm248_vm2 = vcmp.gt.f32.partialorder %v1208_v3, 0.0  ;;  %v1224_v14 = vld [vmem:[%s235_s6] sm:$0xff] }
  0x14   : > { %1065 = vmatmul.mubr.msk.f32.vlgmr.msra.gmra.mrb[0].mxu0 %vm249_vm1, %v244_v2  ;;  %1068 = vmatpush3.msra.mxu1 %v1224_v14 }
  0x15   : > { %1079 = vmatprep.mubr.msk.f32.mxu0 %vm1143_vm0, %v1142_v0  ;;  %412 = vrot.lane.b32.xlu1 %v244_v2, %s1144_s27 }
  0x16   : > { %1072 = vmatprep.subr.mxu1 %v1142_v0 }
  0x19   : > { %580 = vrot.lane.b32.xlu1 %v244_v2, %s1145_s28 }
  0x1d   : > { %749 = vrot.lane.b32.xlu1 %v245_v1, %s1146_s29 }
  0x21   : > { %747 = vrot.lane.b32.xlu1 %v244_v2, %s1146_s29 }
  0x83   : > { %v415_v15 = vpop.permute.xlu1 %414 }
  0x87   : > { %v413_v17 = vpop.permute.xlu1 %412 }
  0x8b   : > { %v581_v19 = vpop.permute.xlu1 %580 }
  0x8f   : > { %v750_v22 = vpop.permute.xlu1 %749 }
  0x93   : > { %v748_v23 = vpop.permute.xlu1 %747 }
  0xe7   : > { %v322_v4 = vpop.f32.mrb[0].mxu0 }
  0xe8   : > { %v326_v5 = vmul.f32 0.35355338, %v322_v4  ;;  %v1066_v6 = vpop.f32.mrb[1].mxu0 }
  0xea   : > { %v327_v7 = vsel %vm248_vm2, %v326_v5, -1e+09 }
  0xeb   : > { %v328_v8 = vsel %vm249_vm1, %v327_v7, -inf }
  0xec   : > { %329 = vmax.xlane.f32.xlu0 %v328_v8 }
 0x179   : > { %v330_v9 = vpop.xlane.xlu0 %329 }
 0x17a   : > { %v331_v10 = vsub.f32 %v327_v7, %v330_v9 }
 0x17c   : > { %v332_v11 = vmul.f32 1.442695, %v331_v10 }
 0x17e   : > { %1118 = vpow2.f32 %v332_v11 }
 0x188   : > { %v1119_v12 = vpop.eup %1118 }
 0x189   : > { %v334_v13 = vsel %vm249_vm1, %v1119_v12, 0.0 }
 0x18a   : > { %335 = vadd.xlane.f32.xlu0 %v334_v13 }
 0x1a0   : > { %582 = vrot.lane.b32.xlu0 %v245_v1, %s1145_s28 }
 0x217   : > { %v336_v16 = vpop.xlane.xlu0 %335 }
 0x218   : > { %1120 = vrcp.f32 %v336_v16 }
 0x21b   : > { %v583_v21 = vpop.permute.xlu0 %582 }
 0x222   : > { %v1121_v18 = vpop.eup %1120 }
 0x223   : > { %v338_v20 = vmul.f32 %v1121_v18, %v1119_v12 }
 0x225   : > { %1070 = vmatmul.mubr.msk.f32.vlgmr.msra.gmra.mrb[0].mxu1 %vm249_vm1, %v338_v20 }
 0x226   : > { %1073 = vmatpush3.xpose.msk.msra.mxu1 %vm249_vm1, %v415_v15  ;;  %1074 = vmatprep.mubr.msk.f32.mxu1 %vm1143_vm0, %v1142_v0 }
 0x227   : > { %1082 = vmatprep.subr.mxu1 %v1142_v0 }
 0x229   : > { %1075 = vmatmul.mubr.msk.f32.vlgmr.msra.gmra.mrb[2].mxu1 %vm249_vm1, %v413_v17 }
 0x22a   : > { %1083 = vmatpush3.xpose.msk.msra.mxu1 %vm249_vm1, %v583_v21  ;;  %1084 = vmatprep.mubr.msk.f32.mxu1 %vm1143_vm0, %v1142_v0 }
 0x22b   : > { %1092 = vmatprep.subr.mxu1 %v1142_v0 }
 0x22d   : > { %1085 = vmatmul.mubr.msk.f32.vlgmr.msra.gmra.mrb[4].mxu1 %vm249_vm1, %v581_v19 }
 0x22e   : > { %1093 = vmatpush3.xpose.msk.msra.mxu1 %vm249_vm1, %v750_v22  ;;  %1094 = vmatprep.mubr.msk.f32.mxu1 %vm1143_vm0, %v1142_v0 }
 0x231   : > { %1095 = vmatmul.mubr.msk.f32.vlgmr.msra.gmra.mrb[6].mxu1 %vm249_vm1, %v748_v23 }
 0x2f8   : > { %v1244_v24 = vpop.f32.mrb[0].mxu1 }
 0x2f9   : > { %v1071_v25 = vpop.f32.mrb[1].mxu1 }
 0x2fc   : > { %v486_v26 = vpop.f32.mrb[2].mxu1 }
 0x2fd   : > { %v490_v27 = vmul.f32 0.35355338, %v486_v26  ;;  %v1076_v28 = vpop.f32.mrb[3].mxu1 }
 0x2ff   : > { %v491_v29 = vsel %vm248_vm2, %v490_v27, -1e+09 }
 0x300   : > { %v654_v30 = vpop.f32.mrb[4].mxu1  ;;  %v492_v31 = vsel %vm249_vm1, %v491_v29, -inf }
 0x301   : > { %v658_v32 = vmul.f32 0.35355338, %v654_v30  ;;  %493 = vmax.xlane.f32.xlu1 %v492_v31  ;;  %v1086_v33 = vpop.f32.mrb[5].mxu1 }
 0x303   : > { %v659_v34 = vsel %vm248_vm2, %v658_v32, -1e+09 }
 0x304   : > { %v821_v35 = vpop.f32.mrb[6].mxu1  ;;  %v660_v36 = vsel %vm249_vm1, %v659_v34, -inf }
 0x305   : > { %v825_v37 = vmul.f32 0.35355338, %v821_v35  ;;  %661 = vmax.xlane.f32.xlu0 %v660_v36  ;;  %v1096_v38 = vpop.f32.mrb[7].mxu1 }
 0x307   : > { %v826_v39 = vsel %vm248_vm2, %v825_v37, -1e+09 }
 0x308   : > { %v827_v40 = vsel %vm249_vm1, %v826_v39, -inf }
 0x309   : > { %828 = vmax.xlane.f32.xlu1 %v827_v40 }
 0x38e   : > { %v494_v41 = vpop.xlane.xlu1 %493 }
 0x38f   : > { %v495_v42 = vsub.f32 %v491_v29, %v494_v41 }
 0x391   : > { %v496_v43 = vmul.f32 1.442695, %v495_v42 }
 0x392   : > { %v662_v44 = vpop.xlane.xlu0 %661 }
 0x393   : > { %1122 = vpow2.f32 %v496_v43  ;;  %v663_v45 = vsub.f32 %v659_v34, %v662_v44 }
 0x395   : > { %v664_v46 = vmul.f32 1.442695, %v663_v45 }
 0x396   : > { %v829_v51 = vpop.xlane.xlu1 %828 }
 0x397   : > { %1124 = vpow2.f32 %v664_v46  ;;  %v830_v52 = vsub.f32 %v826_v39, %v829_v51 }
 0x399   : > { %v831_v53 = vmul.f32 1.442695, %v830_v52 }
 0x39b   : > { %1126 = vpow2.f32 %v831_v53 }
 0x39d   : > { %v1123_v47 = vpop.eup %1122 }
 0x39e   : > { %v498_v48 = vsel %vm249_vm1, %v1123_v47, 0.0 }
 0x39f   : > { %499 = vadd.xlane.f32.xlu1 %v498_v48 }
 0x3a1   : > { %v1125_v49 = vpop.eup %1124 }
 0x3a2   : > { %v666_v50 = vsel %vm249_vm1, %v1125_v49, 0.0 }
 0x3a3   : > { %667 = vadd.xlane.f32.xlu0 %v666_v50 }
 0x3a5   : > { %v1127_v54 = vpop.eup %1126 }
 0x3a6   : > { %v833_v55 = vsel %vm249_vm1, %v1127_v54, 0.0 }
 0x3b0   : > { %671 = vrot.lane.b32.xlu1 %v1224_v14, %s1145_s28 }
 0x3b9   : > { %504 = vrot.lane.b32.xlu0 %v1224_v14, %s1144_s27 }
 0x3d4   : > { %834 = vadd.xlane.f32.xlu1 %v833_v55 }
 0x3e5   : > { %838 = vrot.lane.b32.xlu1 %v1224_v14, %s1146_s29 }
 0x42c   : > { %v500_v56 = vpop.xlane.xlu1 %499 }
 0x42d   : > { %1128 = vrcp.f32 %v500_v56 }
 0x430   : > { %v668_v57 = vpop.xlane.xlu0 %667  ;;  %v672_v61 = vpop.permute.xlu1 %671 }
 0x431   : > { %1130 = vrcp.f32 %v668_v57 }
 0x434   : > { %v505_v58 = vpop.permute.xlu0 %504 }
 0x435   : > { %1078 = vmatpush3.msra.mxu0 %v505_v58 }
 0x436   : > { %1087 = vmatprep.subr.mxu0 %v1142_v0 }
 0x437   : > { %v1129_v59 = vpop.eup %1128 }
 0x438   : > { %v502_v60 = vmul.f32 %v1129_v59, %v1123_v47 }
 0x43a   : > { %1080 = vmatmul.mubr.msk.f32.vlgmr.msra.gmra.mrb[2].mxu0 %vm249_vm1, %v502_v60 }
 0x43b   : > { %v1131_v62 = vpop.eup %1130  ;;  %1088 = vmatpush3.msra.mxu0 %v672_v61  ;;  %1089 = vmatprep.mubr.msk.f32.mxu0 %vm1143_vm0, %v1142_v0 }
 0x43c   : > { %v670_v63 = vmul.f32 %v1131_v62, %v1125_v49  ;;  %1097 = vmatprep.subr.mxu0 %v1142_v0 }
 0x43e   : > { %1090 = vmatmul.mubr.msk.f32.vlgmr.msra.gmra.mrb[4].mxu0 %vm249_vm1, %v670_v63 }
 0x43f   : > { %1099 = vmatprep.mubr.msk.f32.mxu0 %vm1143_vm0, %v1142_v0 }
 0x461   : > { %v835_v1 = vpop.xlane.xlu1 %834 }
 0x462   : > { %1132 = vrcp.f32 %v835_v1 }
 0x465   : > { %v839_v2 = vpop.permute.xlu1 %838 }
 0x466   : > { %1098 = vmatpush3.msra.mxu0 %v839_v2 }
 0x46c   : > { %v1133_v3 = vpop.eup %1132 }
 0x46d   : > { %v837_v4 = vmul.f32 %v1133_v3, %v1127_v54 }
 0x46f   : > { %1100 = vmatmul.mubr.msk.f32.vlgmr.msra.gmra.mrb[6].mxu0 %vm249_vm1, %v837_v4 }
 0x50d   : > { %v576_v5 = vpop.f32.mrb[2].mxu0 }
 0x50e   : > { %915 = vrot.lane.b32.xlu0 %v576_v5, %s1147_s7  ;;  %v1081_v6 = vpop.f32.mrb[3].mxu0 }
 0x511   : > { %v743_v7 = vpop.f32.mrb[4].mxu0 }
 0x512   : > { %919 = vrot.lane.b32.xlu1 %v743_v7, %s1148_s8  ;;  %v1091_v8 = vpop.f32.mrb[5].mxu0 }
 0x542   : > { %v910_v9 = vpop.f32.mrb[6].mxu0 }
 0x543   : > { %923 = vrot.lane.b32.xlu0 %v910_v9, %s1149_s9  ;;  %v1101_v0 = vpop.f32.mrb[7].mxu0 }
 0x580   : > { %v916_v10 = vpop.permute.xlu0 %915 }
 0x581   : > { %v926_v12 = vsel %vm249_vm1, %v1244_v24, %v916_v10 }
 0x584   : > { %v920_v11 = vpop.permute.xlu1 %919 }
 0x585   : > { %v928_v13 = vsel %vm927_vm3, %v926_v12, %v920_v11 }
 0x5b5   : > { %v924_v14 = vpop.permute.xlu0 %923 }
 0x5b6   : > { %v930_v15 = vsel %vm929_vm4, %v928_v13, %v924_v14 }
 0x5b7   : > { %932 = vst.msk [vmem:[%s243_s12] sm:$0xff] %vm931_vm5, %v930_v15 }
 0x5b8 PF: > { %s14_s15 = sadd.s32 1, %s1140_s15  }
 0x5b9   : > { %p11_p4 = scmp.ge.s32.totalorder %s14_s15, 4  }
 0x5bb   :  { %13 = sbr.rel (!%p11_p4) target bundleno = 1 (0x1), region = 75 }

// kernel: transformer_forward.40
= control target key start
LH: loop header
LB: loop body
LE: loop exit
PB: predicated region body
PF: predicated region fallthrough
CT: control target
= control target key end

     0   :  { %vm27_vm0 = vcmask 261120   ;;  %s194_s1 = inlined_call_operand.vmem [shape: f32[32,32], index: 1, kind: input, shape index: {}]   ;;  %s195_s0 = inlined_call_operand.vmem [shape: f32[16,32], index: 0, kind: input, shape index: {}]   ;;  %s196_s2 = inlined_call_operand.vmem [shape: f32[1,32], index: 2, kind: input, shape index: {}]   ;;  %s197_s3 = inlined_call_operand.vmem [shape: f32[16,32], index: 3, kind: output, shape index: {}]  }
   0x1   :  { %v16_v0 = vld [vmem:[%s194_s1] sm:$0xff]  ;;  %v17_v1 = vld [vmem:[%s194_s1 + $0x8] sm:$0xff]  ;;  %v18_v2 = vld [vmem:[%s194_s1 + $0x10] sm:$0xff] }
   0x2   :  { %v135_v3 = vpack.c.bf16 %v17_v1, %v16_v0  ;;  %v19_v4 = vld [vmem:[%s194_s1 + $0x18] sm:$0xff]  ;;  %v14_v5 = vld [vmem:[%s195_s0] sm:$0xff]  ;;  %v15_v7 = vld [vmem:[%s195_s0 + $0x8] sm:$0xff] }
   0x3   :  { %v139_v6 = vpack.c.bf16 %v19_v4, %v18_v2  ;;  %132 = vmatprep.mubr.msk.f32.mxu0 %vm27_vm0, %v14_v5  ;;  %v115_v8 = vld [vmem:[%s196_s2] ss:$0 sm:$0xff] }
   0x4   :  { %136 = vmatprep.subr.bf16.mxu0 %v135_v3 }
   0x5   :  { %138 = vmatpush3.bf16.msra.mxu0 %v135_v3 }
   0x6   :  { %140 = vmatprep.subr.bf16.mxu0 %v139_v6 }
   0x9   :  { %142 = vmatpush3.bf16.msra.mxu0 %v139_v6 }
   0xc   :  { %133 = vmatmul.mubr.msk.f32.vlgmr.msra.gmra.mrb[0].mxu0 %vm27_vm0, %v15_v7 }
  0xdf   :  { %v134_v9 = vpop.f32.mrb[0].mxu0 }
  0xe0   :  { %v106_v10 = vadd.f32 %v134_v9, %v115_v8  ;;  %v100_v11 = vpop.f32.mrb[1].mxu0 }
  0xe1   :  { %v101_v12 = vadd.f32 %v115_v8, %v100_v11 }
  0xe2   :  { %110 = vst.msk [vmem:[%s197_s3 + $0x8] sm:$0xff] %vm27_vm0, %v106_v10 }
  0xe3   :  { %109 = vst.msk [vmem:[%s197_s3] sm:$0xff] %vm27_vm0, %v101_v12 }

// kernel: transformer_forward.30
= control target key start
LH: loop header
LB: loop body
LE: loop exit
PB: predicated region body
PF: predicated region fallthrough
CT: control target
= control target key end

     0   :  { %s1176_s15 = smov 0   ;;  %s1282_s0 = inlined_call_operand.vmem [shape: f32[2,8,32], index: 0, kind: input, shape index: {}]   ;;  %s1283_s1 = inlined_call_operand.vmem [shape: f32[2,8,32], index: 1, kind: input, shape index: {}]   ;;  %s1284_s2 = inlined_call_operand.vmem [shape: f32[2,8,32], index: 2, kind: input, shape index: {}]   ;;  %s1285_s3 = inlined_call_operand.vmem [shape: f32[2,1,8], index: 3, kind: input, shape index: {}]   ;;  %s1286_s4 = inlined_call_operand.vmem [shape: f32[2,8,32], index: 4, kind: output, shape index: {}]  }
   0x1 LB: > { %s1022_s16 = sadd.s32 4294967295, %s1140_s15   ;;  %p1026_p0 = scmp.ge.s32.totalorder %s1140_s15, 1  ;;  %s1140_s15 = sphi %s1176_s15, %s14_s15  }
   0x2   : > { %p187_p1 = scmp.lt.s32.totalorder %s1140_s15, 3 }
   0x4   : > { %p188_p2 = pnand %p1026_p0, %p187_p1 }
   0x5   : > { %p222_p3 = scmp.lt.s32.totalorder (!%p188_p2), %s1022_s16, 1  ;;  %v1142_v0 = vmov (!%p188_p2), 0.0   ;;  %vm1143_vm0 = vmmov (!%p188_p2), 0   ;;  %vm246_vm1 = vcmask (!%p188_p2), 64512   ;;  %v325_v3 = vlaneseq (!%p188_p2)  ;;  %s1145_s27 = smov (!%p188_p2), 120  }
   0x6   : > { %191 = sbr.rel (%p188_p2) target bundleno = 1464 (0x5b8), region = 36  ;;  %1061 = vmatprep.subr.mxu0 (!%p188_p2), %v1142_v0  ;;  %1063 = vmatprep.mubr.msk.f32.mxu0 (!%p188_p2), %vm1143_vm0, %v1142_v0  ;;  %v1144_v7 = vmov (!%p188_p2), 0   ;;  %s1146_s28 = smov (!%p188_p2), 112   ;;  %vm930_vm4 = vcmask (!%p188_p2), 130048   ;;  %vm932_vm5 = vcmask (!%p188_p2), 195584   ;;  %vm934_vm6 = vcmask (!%p188_p2), 261120  }
   0x7   : > { %1066 = vmatprep.subr.mxu1 (!%p188_p2), %v1142_v0  ;;  %1068 = vmatprep.mubr.msk.f32.mxu1 (!%p188_p2), %vm1143_vm0, %v1142_v0  ;;  %v326_v5 = vshrl.u32 (!%p188_p2), %v325_v3, 7  ;;  %s1147_s29 = smov (!%p188_p2), 104   ;;  %s1148_s7 = smov (!%p188_p2), 8  }
   0x8   : > { %s1149_s8 = smov (!%p188_p2), 16   ;;  %s1150_s9 = smov (!%p188_p2), 24  }
   0x9   : > { %v327_v6 = vsub.s32 (!%p188_p2), 0, %v326_v5 }
   0xd   : > { %s1288_s16 = smov (!%p222_p3, %s1022_s16), 1 }
   0xe   : > { %s1190_s17 = sshll.u32 %s1288_s16, 3  ;;  %s236_s26 = scalar_lea.vmem %s1285_s3, %s1288_s16 }
   0xf   : > { %s229_s20 = scalar_lea.vmem %s1283_s1, %s1190_s17  ;;  %s225_s23 = scalar_lea.vmem %s1282_s0, %s1190_s17  ;;  %v244_v4 = vld [vmem:[%s236_s26] sm:$0x1] }
  0x10   : > { %v242_v1 = vld [vmem:[%s229_s20] sm:$0xff]  ;;  %vm245_vm2 = vcmp.gt.f32.partialorder %v244_v4, 0.0  ;;  %s233_s6 = scalar_lea.vmem %s1284_s2, %s1190_s17  ;;  %s240_s12 = scalar_lea.vmem %s1286_s4, %s1190_s17 }
  0x11   : > { %1062 = vmatpush3.xpose.msk.msra.mxu0 %vm246_vm1, %v242_v1  ;;  %v241_v2 = vld [vmem:[%s225_s23] sm:$0xff]  ;;  %v324_v8 = vsel %vm245_vm2, 1, %v1144_v7  ;;  %417 = vrot.lane.b32.xlu1 %v242_v1, %s1145_s27 }
  0x12   : > { %1076 = vmatprep.subr.mxu0 %v1142_v0  ;;  %v1208_v9 = vrot.slane %v324_v8, %v327_v6  ;;  %v1224_v20 = vld [vmem:[%s233_s6] sm:$0xff] }
  0x13   : > { %1067 = vmatpush3.msra.mxu1 %v1224_v20 }
  0x14   : > { %1064 = vmatmul.mubr.msk.f32.vlgmr.msra.gmra.mrb[0].mxu0 %vm246_vm1, %v241_v2  ;;  %vm329_vm3 = vcmp.eq.s32.totalorder %v1208_v9, 1  ;;  %1071 = vmatprep.subr.mxu1 %v1142_v0 }
  0x15   : > { %1078 = vmatprep.mubr.msk.f32.mxu0 %vm1143_vm0, %v1142_v0  ;;  %415 = vrot.lane.b32.xlu1 %v241_v2, %s1145_s27 }
  0x19   : > { %583 = vrot.lane.b32.xlu1 %v241_v2, %s1146_s28 }
  0x1d   : > { %752 = vrot.lane.b32.xlu1 %v242_v1, %s1147_s29 }
  0x21   : > { %750 = vrot.lane.b32.xlu1 %v241_v2, %s1147_s29 }
  0x83   : > { %v418_v21 = vpop.permute.xlu1 %417 }
  0x87   : > { %v416_v23 = vpop.permute.xlu1 %415 }
  0x8b   : > { %v584_v25 = vpop.permute.xlu1 %583 }
  0x8f   : > { %v753_v28 = vpop.permute.xlu1 %752 }
  0x93   : > { %v751_v29 = vpop.permute.xlu1 %750 }
  0xe7   : > { %v319_v10 = vpop.f32.mrb[0].mxu0 }
  0xe8   : > { %v323_v11 = vmul.f32 0.35355338, %v319_v10  ;;  %v1065_v12 = vpop.f32.mrb[1].mxu0 }
  0xea   : > { %v330_v13 = vsel %vm329_vm3, %v323_v11, -1e+09 }
  0xeb   : > { %v331_v14 = vsel %vm246_vm1, %v330_v13, -inf }
  0xec   : > { %332 = vmax.xlane.f32.xlu0 %v331_v14 }
 0x179   : > { %v333_v15 = vpop.xlane.xlu0 %332 }
 0x17a   : > { %v334_v16 = vsub.f32 %v330_v13, %v333_v15 }
 0x17c   : > { %v335_v17 = vmul.f32 1.442695, %v334_v16 }
 0x17e   : > { %1118 = vpow2.f32 %v335_v17 }
 0x188   : > { %v1119_v18 = vpop.eup %1118 }
 0x189   : > { %v337_v19 = vsel %vm246_vm1, %v1119_v18, 0.0 }
 0x18a   : > { %338 = vadd.xlane.f32.xlu0 %v337_v19 }
 0x1a0   : > { %585 = vrot.lane.b32.xlu0 %v242_v1, %s1146_s28 }
 0x217   : > { %v339_v22 = vpop.xlane.xlu0 %338 }
 0x218   : > { %1120 = vrcp.f32 %v339_v22 }
 0x21b   : > { %v586_v27 = vpop.permute.xlu0 %585 }
 0x222   : > { %v1121_v24 = vpop.eup %1120 }
 0x223   : > { %v341_v26 = vmul.f32 %v1121_v24, %v1119_v18 }
 0x225   : > { %1069 = vmatmul.mubr.msk.f32.vlgmr.msra.gmra.mrb[0].mxu1 %vm246_vm1, %v341_v26 }
 0x226   : > { %1072 = vmatpush3.xpose.msk.msra.mxu1 %vm246_vm1, %v418_v21  ;;  %1073 = vmatprep.mubr.msk.f32.mxu1 %vm1143_vm0, %v1142_v0 }
 0x227   : > { %1081 = vmatprep.subr.mxu1 %v1142_v0 }
 0x229   : > { %1074 = vmatmul.mubr.msk.f32.vlgmr.msra.gmra.mrb[2].mxu1 %vm246_vm1, %v416_v23 }
 0x22a   : > { %1082 = vmatpush3.xpose.msk.msra.mxu1 %vm246_vm1, %v586_v27  ;;  %1083 = vmatprep.mubr.msk.f32.mxu1 %vm1143_vm0, %v1142_v0 }
 0x22b   : > { %1091 = vmatprep.subr.mxu1 %v1142_v0 }
 0x22d   : > { %1084 = vmatmul.mubr.msk.f32.vlgmr.msra.gmra.mrb[4].mxu1 %vm246_vm1, %v584_v25 }
 0x22e   : > { %1092 = vmatpush3.xpose.msk.msra.mxu1 %vm246_vm1, %v753_v28  ;;  %1093 = vmatprep.mubr.msk.f32.mxu1 %vm1143_vm0, %v1142_v0 }
 0x231   : > { %1094 = vmatmul.mubr.msk.f32.vlgmr.msra.gmra.mrb[6].mxu1 %vm246_vm1, %v751_v29 }
 0x2f8   : > { %v1244_v30 = vpop.f32.mrb[0].mxu1 }
 0x2f9   : > { %v1070_v31 = vpop.f32.mrb[1].mxu1 }
 0x2fc   : > { %v489_v32 = vpop.f32.mrb[2].mxu1 }
 0x2fd   : > { %v493_v33 = vmul.f32 0.35355338, %v489_v32  ;;  %v1075_v34 = vpop.f32.mrb[3].mxu1 }
 0x2ff   : > { %v494_v35 = vsel %vm329_vm3, %v493_v33, -1e+09 }
 0x300   : > { %v657_v36 = vpop.f32.mrb[4].mxu1  ;;  %v495_v37 = vsel %vm246_vm1, %v494_v35, -inf }
 0x301   : > { %v661_v38 = vmul.f32 0.35355338, %v657_v36  ;;  %496 = vmax.xlane.f32.xlu1 %v495_v37  ;;  %v1085_v39 = vpop.f32.mrb[5].mxu1 }
 0x303   : > { %v662_v40 = vsel %vm329_vm3, %v661_v38, -1e+09 }
 0x304   : > { %v824_v41 = vpop.f32.mrb[6].mxu1  ;;  %v663_v42 = vsel %vm246_vm1, %v662_v40, -inf }
 0x305   : > { %v828_v43 = vmul.f32 0.35355338, %v824_v41  ;;  %664 = vmax.xlane.f32.xlu0 %v663_v42  ;;  %v1095_v44 = vpop.f32.mrb[7].mxu1 }
 0x307   : > { %v829_v45 = vsel %vm329_vm3, %v828_v43, -1e+09 }
 0x308   : > { %v830_v46 = vsel %vm246_vm1, %v829_v45, -inf }
 0x309   : > { %831 = vmax.xlane.f32.xlu1 %v830_v46 }
 0x38e   : > { %v497_v47 = vpop.xlane.xlu1 %496 }
 0x38f   : > { %v498_v48 = vsub.f32 %v494_v35, %v497_v47 }
 0x391   : > { %v499_v49 = vmul.f32 1.442695, %v498_v48 }
 0x392   : > { %v665_v50 = vpop.xlane.xlu0 %664 }
 0x393   : > { %1122 = vpow2.f32 %v499_v49  ;;  %v666_v51 = vsub.f32 %v662_v40, %v665_v50 }
 0x395   : > { %v667_v52 = vmul.f32 1.442695, %v666_v51 }
 0x396   : > { %v832_v57 = vpop.xlane.xlu1 %831 }
 0x397   : > { %1124 = vpow2.f32 %v667_v52  ;;  %v833_v58 = vsub.f32 %v829_v45, %v832_v57 }
 0x399   : > { %v834_v59 = vmul.f32 1.442695, %v833_v58 }
 0x39b   : > { %1126 = vpow2.f32 %v834_v59 }
 0x39d   : > { %v1123_v53 = vpop.eup %1122 }
 0x39e   : > { %v501_v54 = vsel %vm246_vm1, %v1123_v53, 0.0 }
 0x39f   : > { %502 = vadd.xlane.f32.xlu1 %v501_v54 }
 0x3a1   : > { %v1125_v55 = vpop.eup %1124 }
 0x3a2   : > { %v669_v56 = vsel %vm246_vm1, %v1125_v55, 0.0 }
 0x3a3   : > { %670 = vadd.xlane.f32.xlu0 %v669_v56 }
 0x3a5   : > { %v1127_v60 = vpop.eup %1126 }
 0x3a6   : > { %v836_v61 = vsel %vm246_vm1, %v1127_v60, 0.0 }
 0x3b0   : > { %674 = vrot.lane.b32.xlu1 %v1224_v20, %s1146_s28 }
 0x3b9   : > { %507 = vrot.lane.b32.xlu0 %v1224_v20, %s1145_s27 }
 0x3d4   : > { %837 = vadd.xlane.f32.xlu1 %v836_v61 }
 0x3e5   : > { %841 = vrot.lane.b32.xlu1 %v1224_v20, %s1147_s29 }
 0x42c   : > { %v503_v62 = vpop.xlane.xlu1 %502 }
 0x42d   : > { %1128 = vrcp.f32 %v503_v62 }
 0x430   : > { %v671_v63 = vpop.xlane.xlu0 %670  ;;  %v675_v4 = vpop.permute.xlu1 %674 }
 0x431   : > { %1130 = vrcp.f32 %v671_v63 }
 0x434   : > { %v508_v1 = vpop.permute.xlu0 %507 }
 0x435   : > { %1077 = vmatpush3.msra.mxu0 %v508_v1 }
 0x436   : > { %1086 = vmatprep.subr.mxu0 %v1142_v0 }
 0x437   : > { %v1129_v2 = vpop.eup %1128 }
 0x438   : > { %v505_v3 = vmul.f32 %v1129_v2, %v1123_v53 }
 0x43a   : > { %1079 = vmatmul.mubr.msk.f32.vlgmr.msra.gmra.mrb[2].mxu0 %vm246_vm1, %v505_v3 }
 0x43b   : > { %v1131_v5 = vpop.eup %1130  ;;  %1087 = vmatpush3.msra.mxu0 %v675_v4  ;;  %1088 = vmatprep.mubr.msk.f32.mxu0 %vm1143_vm0, %v1142_v0 }
 0x43c   : > { %v673_v6 = vmul.f32 %v1131_v5, %v1125_v55  ;;  %1096 = vmatprep.subr.mxu0 %v1142_v0 }
 0x43e   : > { %1089 = vmatmul.mubr.msk.f32.vlgmr.msra.gmra.mrb[4].mxu0 %vm246_vm1, %v673_v6 }
 0x43f   : > { %1098 = vmatprep.mubr.msk.f32.mxu0 %vm1143_vm0, %v1142_v0 }
 0x461   : > { %v838_v7 = vpop.xlane.xlu1 %837 }
 0x462   : > { %1132 = vrcp.f32 %v838_v7 }
 0x465   : > { %v842_v8 = vpop.permute.xlu1 %841 }
 0x466   : > { %1097 = vmatpush3.msra.mxu0 %v842_v8 }
 0x46c   : > { %v1133_v9 = vpop.eup %1132 }
 0x46d   : > { %v840_v10 = vmul.f32 %v1133_v9, %v1127_v60 }
 0x46f   : > { %1099 = vmatmul.mubr.msk.f32.vlgmr.msra.gmra.mrb[6].mxu0 %vm246_vm1, %v840_v10 }
 0x50d   : > { %v579_v11 = vpop.f32.mrb[2].mxu0 }
 0x50e   : > { %918 = vrot.lane.b32.xlu0 %v579_v11, %s1148_s7  ;;  %v1080_v12 = vpop.f32.mrb[3].mxu0 }
 0x511   : > { %v746_v13 = vpop.f32.mrb[4].mxu0 }
 0x512   : > { %922 = vrot.lane.b32.xlu1 %v746_v13, %s1149_s8  ;;  %v1090_v14 = vpop.f32.mrb[5].mxu0 }
 0x542   : > { %v913_v15 = vpop.f32.mrb[6].mxu0 }
 0x543   : > { %926 = vrot.lane.b32.xlu0 %v913_v15, %s1150_s9  ;;  %v1100_v0 = vpop.f32.mrb[7].mxu0 }
 0x580   : > { %v919_v16 = vpop.permute.xlu0 %918 }
 0x581   : > { %v929_v18 = vsel %vm246_vm1, %v1244_v30, %v919_v16 }
 0x584   : > { %v923_v17 = vpop.permute.xlu1 %922 }
 0x585   : > { %v931_v19 = vsel %vm930_vm4, %v929_v18, %v923_v17 }
 0x5b5   : > { %v927_v20 = vpop.permute.xlu0 %926 }
 0x5b6   : > { %v933_v21 = vsel %vm932_vm5, %v931_v19, %v927_v20 }
 0x5b7   : > { %935 = vst.msk [vmem:[%s240_s12] sm:$0xff] %vm934_vm6, %v933_v21 }
 0x5b8 PF: > { %s14_s15 = sadd.s32 1, %s1140_s15  }
 0x5b9   : > { %p11_p4 = scmp.ge.s32.totalorder %s14_s15, 4  }
 0x5bb   :  { %13 = sbr.rel (!%p11_p4) target bundleno = 1 (0x1), region = 75 }

// kernel: transformer_forward.41
= control target key start
LH: loop header
LB: loop body
LE: loop exit
PB: predicated region body
PF: predicated region fallthrough
CT: control target
= control target key end

     0   :  { %vm27_vm0 = vcmask 261120   ;;  %vm109_vm1 = vcmask 523264   ;;  %s191_s1 = inlined_call_operand.vmem [shape: f32[32,64], index: 1, kind: input, shape index: {}]   ;;  %s192_s0 = inlined_call_operand.vmem [shape: f32[16,32], index: 0, kind: input, shape index: {}]   ;;  %s193_s2 = inlined_call_operand.vmem [shape: f32[1,64], index: 2, kind: input, shape index: {}]   ;;  %s194_s3 = inlined_call_operand.vmem [shape: f32[16,64], index: 3, kind: output, shape index: {}]  }
   0x1   :  { %v16_v0 = vld [vmem:[%s191_s1] sm:$0xff]  ;;  %v17_v1 = vld [vmem:[%s191_s1 + $0x8] sm:$0xff]  ;;  %v18_v2 = vld [vmem:[%s191_s1 + $0x10] sm:$0xff] }
   0x2   :  { %v136_v3 = vpack.c.bf16 %v17_v1, %v16_v0  ;;  %v19_v4 = vld [vmem:[%s191_s1 + $0x18] sm:$0xff]  ;;  %v14_v5 = vld [vmem:[%s192_s0] sm:$0xff]  ;;  %v15_v7 = vld [vmem:[%s192_s0 + $0x8] sm:$0xff] }
   0x3   :  { %v140_v6 = vpack.c.bf16 %v19_v4, %v18_v2  ;;  %133 = vmatprep.mubr.msk.f32.mxu0 %vm27_vm0, %v14_v5  ;;  %v116_v8 = vld [vmem:[%s193_s2] ss:$0 sm:$0xff] }
   0x4   :  { %137 = vmatprep.subr.bf16.mxu0 %v136_v3 }
   0x5   :  { %139 = vmatpush3.bf16.msra.mxu0 %v136_v3 }
   0x6   :  { %141 = vmatprep.subr.bf16.mxu0 %v140_v6 }
   0x9   :  { %143 = vmatpush3.bf16.msra.mxu0 %v140_v6 }
   0xc   :  { %134 = vmatmul.mubr.msk.f32.vlgmr.msra.gmra.mrb[0].mxu0 %vm27_vm0, %v15_v7 }
  0xdf   :  { %v135_v9 = vpop.f32.mrb[0].mxu0 }
  0xe0   :  { %v106_v10 = vadd.f32 %v135_v9, %v116_v8  ;;  %v100_v11 = vpop.f32.mrb[1].mxu0 }
  0xe1   :  { %v101_v12 = vadd.f32 %v116_v8, %v100_v11 }
  0xe2   :  { %111 = vst.msk [vmem:[%s194_s3 + $0x8] sm:$0xff] %vm109_vm1, %v106_v10 }
  0xe3   :  { %110 = vst.msk [vmem:[%s194_s3] sm:$0xff] %vm109_vm1, %v101_v12 }

// kernel: transformer_forward.53
= control target key start
LH: loop header
LB: loop body
LE: loop exit
PB: predicated region body
PF: predicated region fallthrough
CT: control target
= control target key end

     0   :  { %vm28_vm0 = vcmask 261120   ;;  %s243_s0 = inlined_call_operand.vmem [shape: f32[16,32], index: 0, kind: input, shape index: {}]   ;;  %s244_s1 = inlined_call_operand.vmem [shape: f32[32,32], index: 1, kind: input, shape index: {}]   ;;  %s245_s2 = inlined_call_operand.vmem [shape: f32[1,32], index: 2, kind: input, shape index: {}]   ;;  %s246_s3 = inlined_call_operand.hbm [shape: f32[16,32], index: 3, kind: output, shape index: {}]  }
   0x1   :  { %v17_v0 = vld [vmem:[%s244_s1] sm:$0xff]  ;;  %v18_v1 = vld [vmem:[%s244_s1 + $0x8] sm:$0xff]  ;;  %v19_v2 = vld [vmem:[%s244_s1 + $0x10] sm:$0xff] }
   0x2   :  { %v148_v3 = vpack.c.bf16 %v18_v1, %v17_v0  ;;  %v20_v4 = vld [vmem:[%s244_s1 + $0x18] sm:$0xff]  ;;  %v15_v5 = vld [vmem:[%s243_s0] sm:$0xff] }
   0x3   :  { %v152_v6 = vpack.c.bf16 %v20_v4, %v19_v2  ;;  %145 = vmatprep.mubr.msk.f32.mxu0 %vm28_vm0, %v15_v5 }
   0x4   :  { %8 = vsyncpa [#allocation3], 0  ;;  %149 = vmatprep.subr.bf16.mxu0 %v148_v3  ;;  %v16_v7 = vld [vmem:[%s243_s0 + $0x8] sm:$0xff]  ;;  %v128_v8 = vld [vmem:[%s245_s2] ss:$0 sm:$0xff]  ;;  %s183_s25 = smov [#allocation2]  }
   0x5   :  { %151 = vmatpush3.bf16.msra.mxu0 %v148_v3  ;;  %s117_s26 = sshll.u32 %s183_s25, 4  ;;  %s118_s26 = int_to_ptr.vmem [resolvable:$true] %s117_s26 }
   0x6   :  { %153 = vmatprep.subr.bf16.mxu0 %v152_v6  ;;  %s159_s27 = scalar_lea.vmem %s118_s26, 256  ;;  %p164_p1 = scmp.lt.s32.totalorder %s118_s26, %s118_s26 }
   0x7   :  { %p160_p0 = scmp.ne.s32.totalorder %s118_s26, %s159_s27  ;;  %p165_p2 = scmp.lt.s32.totalorder %s159_s27, %s159_s27 }
   0x9   :  { %155 = vmatpush3.bf16.msra.mxu0 %v152_v6  ;;  %p166_p3 = por %p165_p2, %p164_p1 }
   0xb   :  { %p167_p4 = pnand %p166_p3, %p160_p0 }
   0xc   :  { %146 = vmatmul.mubr.msk.f32.vlgmr.msra.gmra.mrb[0].mxu0 %vm28_vm0, %v16_v7 }
  0xdf   :  { %v147_v9 = vpop.f32.mrb[0].mxu0 }
  0xe0   :  { %v107_v10 = vadd.f32 %v147_v9, %v128_v8  ;;  %v101_v11 = vpop.f32.mrb[1].mxu0 }
  0xe1   :  { %v102_v12 = vadd.f32 %v128_v8, %v101_v11 }
  0xe2   :  { %111 = vst.msk [vmem:[#allocation2 + $0x8] sm:$0xff] %vm28_vm0, %v107_v10 }
  0xe3   :  { %110 = vst.msk [vmem:[#allocation2] sm:$0xff] %vm28_vm0, %v102_v12 }
  0xe4   :  { %170 = shalt.err (!%p167_p4)
}
  0xe5   :  { %s171_s28 = scalar_lea.hbm %s246_s3, 256 }
  0xe6   :  { %p172_p5 = scmp.ne.s32.totalorder %s246_s3, %s171_s28  ;;  %p175_p6 = scmp.lt.u32.totalorder %s171_s28, %s246_s3 }
  0xe8   :  { %p177_p7 = pnand %p175_p6, %p172_p5 }
  0xea   :  { %180 = shalt.err (!%p177_p7)
}
  0xeb   :  { %s184_s6 = smov 128   ;;  %s185_s7 = smov 8  }
  0xec   :  { %123 = dma.vmem_to_hbm [thread:$0]  %s118_s26, 256, %s246_s3, [#allocation3], %s184_s6, %s184_s6, %s185_s7  }
  0xed   :  { %181 = dma.done.wait [#allocation3], 256  }
  0xee   :  { %182 = vsyncadd [#allocation3], 4294967040 }
  0xef   :  { %127 = vsyncpa [#allocation3], 1 }

// kernel: transformer_forward.32
= control target key start
LH: loop header
LB: loop body
LE: loop exit
PB: predicated region body
PF: predicated region fallthrough
CT: control target
= control target key end

     0   :  { %vm39_vm0 = vcmask 261120   ;;  %vm138_vm1 = vcmask 523264   ;;  %s463_s1 = inlined_call_operand.vmem [shape: f32[32,64], index: 1, kind: input, shape index: {}]   ;;  %s464_s0 = inlined_call_operand.vmem [shape: f32[16,32], index: 0, kind: input, shape index: {}]   ;;  %s465_s3 = inlined_call_operand.vmem [shape: f32[64,32], index: 3, kind: input, shape index: {}]   ;;  %s466_s2 = inlined_call_operand.vmem [shape: f32[1,64], index: 2, kind: input, shape index: {}]   ;;  %s467_s4 = inlined_call_operand.vmem [shape: f32[1,32], index: 4, kind: input, shape index: {}]   ;;  %s468_s5 = inlined_call_operand.vmem [shape: f32[1,32], index: 5, kind: input, shape index: {}]   ;;  %s469_s6 = inlined_call_operand.vmem [shape: f32[1,32], index: 6, kind: input, shape index: {}]   ;;  %s470_s7 = inlined_call_operand.vmem [shape: f32[16,32], index: 7, kind: output, shape index: {}]  }
   0x1   :  { %v28_v0 = vld [vmem:[%s463_s1] sm:$0xff]  ;;  %v29_v1 = vld [vmem:[%s463_s1 + $0x8] sm:$0xff]  ;;  %v30_v2 = vld [vmem:[%s463_s1 + $0x10] sm:$0xff] }
   0x2   :  { %v327_v3 = vpack.c.bf16 %v29_v1, %v28_v0  ;;  %v31_v4 = vld [vmem:[%s463_s1 + $0x18] sm:$0xff]  ;;  %v26_v5 = vld [vmem:[%s464_s0] sm:$0xff]  ;;  %v124_v8 = vld [vmem:[%s465_s3 + $0x8] sm:$0xff] }
   0x3   :  { %v331_v6 = vpack.c.bf16 %v31_v4, %v30_v2  ;;  %305 = vmatprep.mubr.msk.f32.mxu0 %vm39_vm0, %v26_v5  ;;  %v123_v7 = vld [vmem:[%s465_s3] sm:$0xff]  ;;  %v125_v9 = vld [vmem:[%s465_s3 + $0x10] sm:$0xff]  ;;  %v126_v11 = vld [vmem:[%s465_s3 + $0x18] sm:$0xff] }
   0x4   :  { %328 = vmatprep.subr.bf16.mxu0 %v327_v3  ;;  %v335_v10 = vpack.c.bf16 %v124_v8, %v123_v7  ;;  %v339_v12 = vpack.c.bf16 %v126_v11, %v125_v9  ;;  %v127_v13 = vld [vmem:[%s465_s3 + $0x20] sm:$0xff]  ;;  %v128_v14 = vld [vmem:[%s465_s3 + $0x28] sm:$0xff]  ;;  %v129_v17 = vld [vmem:[%s465_s3 + $0x30] sm:$0xff] }
   0x5   :  { %330 = vmatpush3.bf16.msra.mxu0 %v327_v3  ;;  %v343_v15 = vpack.c.bf16 %v128_v14, %v127_v13  ;;  %v27_v16 = vld [vmem:[%s464_s0 + $0x8] sm:$0xff]  ;;  %v130_v18 = vld [vmem:[%s465_s3 + $0x38] sm:$0xff]  ;;  %v273_v20 = vld [vmem:[%s466_s2] ss:$0 sm:$0xff] }
   0x6   :  { %332 = vmatprep.subr.bf16.mxu0 %v331_v6  ;;  %336 = vmatprep.subr.bf16.mxu1 %v335_v10  ;;  %v347_v19 = vpack.c.bf16 %v130_v18, %v129_v17  ;;  %v276_v27 = vld [vmem:[%s467_s4] ss:$0 sm:$0xff] }
   0x7   :  { %338 = vmatpush3.bf16.msra.mxu1 %v335_v10  ;;  %v279_v53 = vld [vmem:[%s468_s5] ss:$0 sm:$0xff] }
   0x8   :  { %340 = vmatprep.subr.bf16.mxu1 %v339_v12  ;;  %v280_v55 = vld [vmem:[%s469_s6] ss:$0 sm:$0xff] }
   0x9   :  { %334 = vmatpush3.bf16.msra.mxu0 %v331_v6 }
   0xb   :  { %342 = vmatpush3.bf16.msra.mxu1 %v339_v12 }
   0xc   :  { %306 = vmatmul.mubr.msk.f32.vlgmr.msra.gmra.mrb[0].mxu0 %vm39_vm0, %v27_v16  ;;  %344 = vmatprep.subr.bf16.mxu1 %v343_v15 }
   0xf   :  { %346 = vmatpush3.bf16.msra.mxu1 %v343_v15 }
  0x10   :  { %348 = vmatprep.subr.bf16.mxu1 %v347_v19 }
  0x13   :  { %350 = vmatpush3.bf16.msra.mxu1 %v347_v19 }
  0xdf   :  { %v307_v21 = vpop.f32.mrb[0].mxu0 }
  0xe0   :  { %v118_v22 = vadd.f32 %v307_v21, %v273_v20  ;;  %v112_v23 = vpop.f32.mrb[1].mxu0 }
  0xe1   :  { %v113_v24 = vadd.f32 %v273_v20, %v112_v23 }
  0xe2   :  { %v122_v26 = vmax.f32 %v118_v22, 0.0 }
  0xe3   :  { %v121_v25 = vmax.f32 %v113_v24, 0.0 }
  0xe5   :  { %324 = vmatprep.mubr.msk.f32.mxu1 %vm138_vm1, %v121_v25 }
  0xe6   :  { %325 = vmatmul.mubr.msk.f32.vlgmr.msra.gmra.mrb[0].mxu1 %vm138_vm1, %v122_v26 }
 0x1b9   :  { %v326_v28 = vpop.f32.mrb[0].mxu1 }
 0x1ba   :  { %v211_v29 = vpop.f32.mrb[1].mxu1  ;;  %v217_v30 = vadd.f32 %v326_v28, %v276_v27 }
 0x1bb   :  { %v212_v31 = vadd.f32 %v276_v27, %v211_v29 }
 0x1bc   :  { %v221_v34 = vadd.f32 %v217_v30, %v27_v16 }
 0x1bd   :  { %v220_v32 = vadd.f32 %v212_v31, %v26_v5 }
 0x1be   :  { %v227_v35 = vsel %vm39_vm0, %v221_v34, 0.0 }
 0x1bf   :  { %v224_v33 = vsel %vm39_vm0, %v220_v32, 0.0 }
 0x1c0   :  { %225 = vadd.xlane.f32.xlu0 %v224_v33 }
 0x1c4   :  { %228 = vadd.xlane.f32.xlu0 %v227_v35 }
 0x24d   :  { %v226_v36 = vpop.xlane.xlu0 %225 }
 0x24e   :  { %v231_v37 = vmul.f32 0.03125, %v226_v36 }
 0x250   :  { %v233_v38 = vsub.f32 %v220_v32, %v231_v37 }
 0x251   :  { %v229_v39 = vpop.xlane.xlu0 %228 }
 0x252   :  { %v232_v40 = vmul.f32 0.03125, %v229_v39  ;;  %v235_v41 = vmul.f32 %v233_v38, %v233_v38 }
 0x254   :  { %v234_v42 = vsub.f32 %v221_v34, %v232_v40  ;;  %v237_v43 = vsel %vm39_vm0, %v235_v41, 0.0 }
 0x255   :  { %238 = vadd.xlane.f32.xlu1 %v237_v43 }
 0x256   :  { %v236_v44 = vmul.f32 %v234_v42, %v234_v42 }
 0x258   :  { %v240_v45 = vsel %vm39_vm0, %v236_v44, 0.0 }
 0x259   :  { %241 = vadd.xlane.f32.xlu1 %v240_v45 }
 0x2e2   :  { %v239_v46 = vpop.xlane.xlu1 %238 }
 0x2e3   :  { %v243_v47 = vmul.f32 0.03125, %v239_v46 }
 0x2e5   :  { %v245_v48 = vadd.f32 1e-05, %v243_v47 }
 0x2e6   :  { %v242_v49 = vpop.xlane.xlu1 %241 }
 0x2e7   :  { %351 = vrsqrt.f32 %v245_v48  ;;  %v244_v50 = vmul.f32 0.03125, %v242_v49 }
 0x2e9   :  { %v246_v51 = vadd.f32 1e-05, %v244_v50 }
 0x2eb   :  { %353 = vrsqrt.f32 %v246_v51 }
 0x2f1   :  { %v352_v52 = vpop.eup %351 }
 0x2f2   :  { %v249_v54 = vmul.f32 %v352_v52, %v233_v38 }
 0x2f4   :  { %v257_v56 = vmul.f32 %v279_v53, %v249_v54 }
 0x2f5   :  { %v354_v57 = vpop.eup %353 }
 0x2f6   :  { %v265_v58 = vadd.f32 %v280_v55, %v257_v56  ;;  %v250_v59 = vmul.f32 %v354_v57, %v234_v42 }
 0x2f8   :  { %267 = vst.msk [vmem:[%s470_s7] sm:$0xff] %vm39_vm0, %v265_v58  ;;  %v258_v60 = vmul.f32 %v279_v53, %v250_v59 }
 0x2fa   :  { %v266_v61 = vadd.f32 %v280_v55, %v258_v60 }
 0x2fc   :  { %268 = vst.msk [vmem:[%s470_s7 + $0x8] sm:$0xff] %vm39_vm0, %v266_v61 }

</bundles_post_ra>
